<compile_context>
chip_gen: v7x
topology: tpu7x:2x2x1
jax: 0.10.0
libtpu: 0.0.40
codegen_flags: <defaults>
</compile_context>

<pallas_src>
import math

import jax
import jax.numpy as jnp
from jax import lax
from jax.experimental import pallas as pl
from jax.experimental.pallas import tpu as pltpu


D_MODEL = 32
NHEAD_GLOBAL = 8
NHEAD_LOCAL = NHEAD_GLOBAL // 2
HD_LOCAL = D_MODEL // NHEAD_LOCAL        # 8
HD_GLOBAL = D_MODEL // NHEAD_GLOBAL      # 4
SEQ_LEN = 6                              # fixed by the 6x6 kinematic mask
BATCH = 2

ROWS = SEQ_LEN * BATCH                   # 12 token rows (seq-major)
QKV_W = 2 * D_MODEL                      # shared 64-wide column layout: [local | global]
BLK = 16                                 # padded rows per stacked head block (multiple of 8)
NBLK = NHEAD_LOCAL + NHEAD_GLOBAL        # 12 stacked head blocks (4 local + 8 global)
STACK = NBLK * BLK                       # 192 stacked rows
NEG = -1e9                               # cross-batch exclusion bias


def kinematic_mask() -> jnp.ndarray:
    m = [[1, 1, 1, 1, 1, 1],
         [1, 1, 0, 1, 0, 0],
         [1, 0, 1, 1, 0, 0],
         [1, 1, 1, 1, 1, 1],
         [1, 0, 0, 1, 1, 0],
         [1, 0, 0, 1, 0, 1]]
    return jnp.asarray(m, dtype=jnp.float32)


# ------------------------------- Pallas kernel --------------------------------

def hier_attn_kernel(x_ref, w_in_ref, w_out_ref, addbias_ref, o_ref):
    f32 = jnp.float32

    x = x_ref[...]                                    # (12, 32)
    w_in = w_in_ref[0:D_MODEL, :]                     # (32, 192)
    b_in = w_in_ref[D_MODEL:D_MODEL + 1, :]           # (1, 192)
    w_out = w_out_ref[0:QKV_W, :]                     # (64, 32)
    b_out = w_out_ref[QKV_W:QKV_W + 1, :]             # (1, 32)

    # One fused in-projection for both attention branches; the softmax scale is
    # already folded into the Q columns of w_in / b_in.
    qkv = jnp.dot(x, w_in, preferred_element_type=f32) + b_in        # (12, 192)
    q = qkv[:, 0:QKV_W]                        # (12, 64)  [local Q*s | global Q*s]
    k = qkv[:, QKV_W:2 * QKV_W]                # (12, 64)  [local K   | global K  ]
    v = qkv[:, 2 * QKV_W:3 * QKV_W]            # (12, 64)  [local V   | global V  ]

    # ---- structural 0/1 matrices (iota + shifts + compares only) -------------
    # Column -> owning stacked head block:
    #   local head h  -> cols [8h, 8h+8)        -> block h
    #   global head h -> cols [32+4h, 32+4h+4)  -> block NHEAD_LOCAL + h
    r_i = lax.broadcasted_iota(jnp.int32, (STACK, QKV_W), 0)
    c_i = lax.broadcasted_iota(jnp.int32, (STACK, QKV_W), 1)
    col_blk = jnp.where(c_i < D_MODEL,
                        jnp.right_shift(c_i, 3),
                        jnp.right_shift(c_i, 2) - NHEAD_LOCAL)
    row_blk = jnp.right_shift(r_i, 4)                                  # BLK == 16
    col_mask = jnp.where(row_blk == col_blk, 1.0, 0.0)                 # (192, 64)

    # Replication matrix: stacked row b*16+i  <-  token row i (pad rows -> all-zero).
    rr = lax.broadcasted_iota(jnp.int32, (STACK, ROWS), 0)
    jj = lax.broadcasted_iota(jnp.int32, (STACK, ROWS), 1)
    rep = jnp.where(jnp.bitwise_and(rr, BLK - 1) == jj, 1.0, 0.0)      # (192, 12)

    # Head-block sum matrix: token row i  <-  sum over blocks of stacked row b*16+i.
    ii = lax.broadcasted_iota(jnp.int32, (ROWS, STACK), 0)
    ss = lax.broadcasted_iota(jnp.int32, (ROWS, STACK), 1)
    blk_sum = jnp.where(jnp.bitwise_and(ss, BLK - 1) == ii, 1.0, 0.0)  # (12, 192)

    # ---- stacked attention: every (branch, head, batch) pair at once ---------
    q_stack = jnp.dot(rep, q, preferred_element_type=f32) * col_mask   # (192, 64)
    s = lax.dot_general(q_stack, k, (((1,), (1,)), ((), ())),
                        preferred_element_type=f32)                    # (192, 12)
    # kinematic float mask (global blocks only) + cross-batch -1e9 exclusion
    s = s + addbias_ref[...]

    s = s - jnp.max(s, axis=-1, keepdims=True)
    p = jnp.exp(s)
    p = p * pl.reciprocal(jnp.sum(p, axis=-1, keepdims=True), approx=False)

    ctx_stack = jnp.dot(p, v, preferred_element_type=f32) * col_mask   # (192, 64)
    ctx = jnp.dot(blk_sum, ctx_stack, preferred_element_type=f32)      # (12, 64)

    # One fused output projection: rows 0:32 = local out-proj, rows 32:64 = global;
    # the local_feat + global_feat sum falls out of the single matmul.
    out = jnp.dot(ctx, w_out, preferred_element_type=f32) + b_out      # (12, 32)
    o_ref[...] = out.astype(o_ref.dtype)


# ----------------------- host-side (init-time) packing ------------------------

def pack_params(params, mask6):
    """One-time, init-style packing of both MultiheadAttention parameter sets.

    params hold the PyTorch weights pre-transposed:
      w*_in: in_proj_weight.T (E, 3E),   b*_in: (1, 3E)
      w*_out: out_proj.weight.T (E, E),  b*_out: (1, E)
    """
    E = D_MODEL
    scale_l = 1.0 / math.sqrt(HD_LOCAL)
    scale_g = 1.0 / math.sqrt(HD_GLOBAL)

    wl_in, bl_in = params["wl_in"], params["bl_in"]
    wg_in, bg_in = params["wg_in"], params["bg_in"]

    def cat_lg(a_l, a_g):
        return jnp.concatenate([a_l, a_g], axis=1)

    # Shared 64-wide [local | global] column layout for each of Q, K, V;
    # softmax scale folded into the Q columns (exact up to fp rounding).
    w_in = jnp.concatenate([
        cat_lg(wl_in[:, 0:E] * scale_l, wg_in[:, 0:E] * scale_g),       # Q
        cat_lg(wl_in[:, E:2 * E], wg_in[:, E:2 * E]),                   # K
        cat_lg(wl_in[:, 2 * E:3 * E], wg_in[:, 2 * E:3 * E]),           # V
    ], axis=1)                                                           # (32, 192)
    b_in = jnp.concatenate([
        cat_lg(bl_in[:, 0:E] * scale_l, bg_in[:, 0:E] * scale_g),
        cat_lg(bl_in[:, E:2 * E], bg_in[:, E:2 * E]),
        cat_lg(bl_in[:, 2 * E:3 * E], bg_in[:, 2 * E:3 * E]),
    ], axis=1)                                                           # (1, 192)
    w_in_slab = jnp.concatenate([w_in, b_in], axis=0)                    # (33, 192)

    w_out = jnp.concatenate([params["wl_out"], params["wg_out"]], axis=0)   # (64, 32)
    b_out = params["bl_out"] + params["bg_out"]                             # (1, 32)
    w_out_slab = jnp.concatenate([w_out, b_out], axis=0)                    # (65, 32)

    # Additive score bias for the stacked (192, 12) score matrix:
    #   cross-batch key           -> -1e9 (excluded from the per-token softmax)
    #   same batch, global block  -> + kinematic float mask value (PyTorch ADDS it)
    #   same batch, local block   -> + 0
    #   pad rows (i >= 12)        -> 0 (their context is dropped by the block-sum)
    # NOTE: the 0/1 kinematic mask is a FLOAT attn_mask in PyTorch, so it is added
    # to the scores rather than used as a boolean -inf mask (matches the module).
    r = jnp.arange(STACK)[:, None]
    j = jnp.arange(ROWS)[None, :]
    blk = r // BLK
    i = r % BLK
    valid = i < ROWS
    iq = jnp.minimum(i, ROWS - 1)
    same_batch = (iq % BATCH) == (j % BATCH)
    kin = mask6[iq // BATCH, j // BATCH]
    in_batch_bias = jnp.where(blk >= NHEAD_LOCAL, kin, 0.0)
    bias = jnp.where(same_batch, in_batch_bias, NEG)
    addbias = jnp.where(valid, bias, 0.0).astype(jnp.float32)               # (192, 12)

    return dict(w_in_slab=w_in_slab, w_out_slab=w_out_slab, addbias=addbias)


# --------------------------------- wrapper -------------------------------------

def hierarchical_attention(x, packed):
    """x: (L, N, E) seq-first (PyTorch MultiheadAttention default) -> (L, N, E)."""
    seq, batch, d_model = x.shape
    assert (seq, batch, d_model) == (SEQ_LEN, BATCH, D_MODEL)
    # Free reshape (no transpose): seq-major token rows.
    x2d = x.reshape(seq * batch, d_model)

    flops = 2 * (ROWS * D_MODEL * 3 * QKV_W        # fused in-projection
                 + STACK * ROWS * QKV_W            # Q replication
                 + STACK * QKV_W * ROWS            # stacked scores
                 + STACK * ROWS * QKV_W            # stacked context
                 + ROWS * STACK * QKV_W            # head-block reduction
                 + ROWS * QKV_W * D_MODEL)         # fused out-projection
    cost = pl.CostEstimate(
        flops=int(flops),
        transcendentals=int(STACK * ROWS + STACK),
        bytes_accessed=int(4 * (x2d.size + packed["w_in_slab"].size
                                + packed["w_out_slab"].size
                                + packed["addbias"].size + ROWS * D_MODEL)))

    vmem = pl.BlockSpec(memory_space=pltpu.MemorySpace.VMEM)
    # grid=() on purpose: total residency << 1 MiB of VMEM, so any grid step would
    # only add per-step overhead.  NOTE: if this op is ever run with a large batch,
    # add a leading "parallel" grid axis over batch so v7x's second TensorCore can
    # share the work; at batch=2 a single launch is faster.
    out2d = pl.pallas_call(
        hier_attn_kernel,
        out_shape=jax.ShapeDtypeStruct((seq * batch, d_model), x.dtype),
        in_specs=[vmem, vmem, vmem, vmem],
        out_specs=vmem,
        cost_estimate=cost,
    )(x2d, packed["w_in_slab"], packed["w_out_slab"], packed["addbias"])

    # Free reshape back to (L, N, E); rows are already in seq-major order.
    return out2d.reshape(seq, batch, d_model)


# ----------------------------- pure-JAX reference ------------------------------

def mha_ref(x, w_in_t, b_in, w_out_t, b_out, nheads, mask=None):
    """nn.MultiheadAttention forward, seq-first x: (L, N, E)."""
    seq, batch, d_model = x.shape
    hd = d_model // nheads
    scale = 1.0 / math.sqrt(hd)
    qkv = jnp.einsum("lne,ef->lnf", x, w_in_t) + b_in        # (L, N, 3E)
    q, k, v = jnp.split(qkv, 3, axis=-1)

    def to_heads(t):
        return t.reshape(seq, batch, nheads, hd).transpose(1, 2, 0, 3)   # (N,H,L,hd)

    q = to_heads(q) * scale
    k = to_heads(k)
    v = to_heads(v)
    s = jnp.einsum("nhld,nhmd->nhlm", q, k)
    if mask is not None:
        s = s + mask[None, None]
    p = jax.nn.softmax(s, axis=-1)
    ctx = jnp.einsum("nhlm,nhmd->nhld", p, v)
    ctx = ctx.transpose(2, 0, 1, 3).reshape(seq, batch, d_model)
    return jnp.einsum("lne,ef->lnf", ctx, w_out_t) + b_out


def hierarchical_attention_ref(x, params, mask):
    local = mha_ref(x, params["wl_in"], params["bl_in"],
                    params["wl_out"], params["bl_out"], NHEAD_LOCAL, None)
    glob = mha_ref(x, params["wg_in"], params["bg_in"],
                   params["wg_out"], params["bg_out"], NHEAD_GLOBAL, mask)
    return local + glob


if __name__ == "__main__":
    key = jax.random.PRNGKey(0)
    k_x, k_local, k_global = jax.random.split(key, 3)

    L, N, E = SEQ_LEN, BATCH, D_MODEL
    x = jax.random.normal(k_x, (L, N, E), dtype=jnp.float32)

    def init_mha_params(k):
        k1, k2, k3, k4 = jax.random.split(k, 4)
        # Stored pre-transposed: in_proj_weight.T (E, 3E), out_proj.weight.T (E, E)
        w_in_t = jax.random.normal(k1, (E, 3 * E), jnp.float32) / math.sqrt(E)
        b_in = jax.random.normal(k2, (1, 3 * E), jnp.float32) * 0.02
        w_out_t = jax.random.normal(k3, (E, E), jnp.float32) / math.sqrt(E)
        b_out = jax.random.normal(k4, (1, E), jnp.float32) * 0.02
        return w_in_t, b_in, w_out_t, b_out

    wl_in, bl_in, wl_out, bl_out = init_mha_params(k_local)
    wg_in, bg_in, wg_out, bg_out = init_mha_params(k_global)
    params = dict(wl_in=wl_in, bl_in=bl_in, wl_out=wl_out, bl_out=bl_out,
                  wg_in=wg_in, bg_in=bg_in, wg_out=wg_out, bg_out=bg_out)

    mask = kinematic_mask()
    packed = pack_params(params, mask)          # one-time, init-style packing

    fwd = jax.jit(hierarchical_attention)
    out = fwd(x, packed)
    jax.block_until_ready(out)
    assert out.shape == (L, N, E), out.shape

    ref = hierarchical_attention_ref(x, params, mask)
    err = float(jnp.max(jnp.abs(out - ref)))
    assert jnp.allclose(out, ref, atol=2e-5, rtol=2e-5), f"mismatch vs reference: {err}"

    print("KERNEL_OK")
</pallas_src>

<mosaic_0001>
module attributes {stable_mosaic.version = 11 : i64} {
  func.func @hier_attn_kernel(%arg0: memref<12x32xf32, #tpu.memory_space<vmem>>, %arg1: memref<33x192xf32, #tpu.memory_space<vmem>>, %arg2: memref<65x32xf32, #tpu.memory_space<vmem>>, %arg3: memref<192x12xf32, #tpu.memory_space<vmem>>, %arg4: memref<12x32xf32, #tpu.memory_space<vmem>>) attributes {dimension_semantics = [], scalar_prefetch = 0 : i64, scratch_operands = 0 : i64, tpu.core_type = #tpu.core_type<tc>} {
    %c0 = arith.constant 0 : index
    %c0_0 = arith.constant 0 : index
    %0 = vector.load %arg0[%c0, %c0_0] : memref<12x32xf32, #tpu.memory_space<vmem>>, vector<12x32xf32>
    %c0_1 = arith.constant 0 : index
    %c0_2 = arith.constant 0 : index
    %1 = vector.load %arg1[%c0_1, %c0_2] : memref<33x192xf32, #tpu.memory_space<vmem>>, vector<32x192xf32>
    %c32 = arith.constant 32 : index
    %c0_3 = arith.constant 0 : index
    %2 = vector.load %arg1[%c32, %c0_3] : memref<33x192xf32, #tpu.memory_space<vmem>>, vector<1x192xf32>
    %c0_4 = arith.constant 0 : index
    %c0_5 = arith.constant 0 : index
    %3 = vector.load %arg2[%c0_4, %c0_5] : memref<65x32xf32, #tpu.memory_space<vmem>>, vector<64x32xf32>
    %c64 = arith.constant 64 : index
    %c0_6 = arith.constant 0 : index
    %4 = vector.load %arg2[%c64, %c0_6] : memref<65x32xf32, #tpu.memory_space<vmem>>, vector<1x32xf32>
    %cst = arith.constant dense<0.000000e+00> : vector<12x192xf32>
    %5 = tpu.matmul %0, %1, %cst {dimension_numbers = #tpu.dot_dimension_numbers<[1], [0], [0], [1], [0, 0, 1, 1], [], []>} : vector<12x32xf32>, vector<32x192xf32>, vector<12x192xf32> -> vector<12x192xf32>
    %6 = vector.broadcast %2 : vector<1x192xf32> to vector<12x192xf32>
    %7 = arith.addf %5, %6 : vector<12x192xf32>
    %8 = vector.extract_strided_slice %7 {offsets = [0, 0], sizes = [12, 64], strides = [1, 1]} : vector<12x192xf32> to vector<12x64xf32>
    %9 = vector.extract_strided_slice %7 {offsets = [0, 64], sizes = [12, 64], strides = [1, 1]} : vector<12x192xf32> to vector<12x64xf32>
    %10 = vector.extract_strided_slice %7 {offsets = [0, 128], sizes = [12, 64], strides = [1, 1]} : vector<12x192xf32> to vector<12x64xf32>
    %11 = tpu.iota {dimensions = array<i32: 0>} : vector<192x64xi32>
    %12 = tpu.iota {dimensions = array<i32: 1>} : vector<192x64xi32>
    %c32_i32 = arith.constant 32 : i32
    %13 = vector.broadcast %c32_i32 : i32 to vector<192x64xi32>
    %14 = arith.cmpi slt, %12, %13 : vector<192x64xi32>
    %c3_i32 = arith.constant 3 : i32
    %15 = vector.broadcast %c3_i32 : i32 to vector<192x64xi32>
    %16 = arith.shrsi %12, %15 : vector<192x64xi32>
    %c2_i32 = arith.constant 2 : i32
    %17 = vector.broadcast %c2_i32 : i32 to vector<192x64xi32>
    %18 = arith.shrsi %12, %17 : vector<192x64xi32>
    %c4_i32 = arith.constant 4 : i32
    %19 = vector.broadcast %c4_i32 : i32 to vector<192x64xi32>
    %20 = arith.subi %18, %19 : vector<192x64xi32>
    %21 = arith.select %14, %16, %20 : vector<192x64xi1>, vector<192x64xi32>
    %c4_i32_7 = arith.constant 4 : i32
    %22 = vector.broadcast %c4_i32_7 : i32 to vector<192x64xi32>
    %23 = arith.shrsi %11, %22 : vector<192x64xi32>
    %24 = arith.cmpi eq, %23, %21 : vector<192x64xi32>
    %cst_8 = arith.constant 1.000000e+00 : f32
    %cst_9 = arith.constant 0.000000e+00 : f32
    %25 = vector.broadcast %cst_8 : f32 to vector<192x64xf32>
    %26 = vector.broadcast %cst_9 : f32 to vector<192x64xf32>
    %27 = arith.select %24, %25, %26 : vector<192x64xi1>, vector<192x64xf32>
    %28 = tpu.iota {dimensions = array<i32: 0>} : vector<192x12xi32>
    %29 = tpu.iota {dimensions = array<i32: 1>} : vector<192x12xi32>
    %c15_i32 = arith.constant 15 : i32
    %30 = vector.broadcast %c15_i32 : i32 to vector<192x12xi32>
    %31 = arith.andi %28, %30 : vector<192x12xi32>
    %32 = arith.cmpi eq, %31, %29 : vector<192x12xi32>
    %cst_10 = arith.constant 1.000000e+00 : f32
    %cst_11 = arith.constant 0.000000e+00 : f32
    %33 = vector.broadcast %cst_10 : f32 to vector<192x12xf32>
    %34 = vector.broadcast %cst_11 : f32 to vector<192x12xf32>
    %35 = arith.select %32, %33, %34 : vector<192x12xi1>, vector<192x12xf32>
    %36 = tpu.iota {dimensions = array<i32: 0>} : vector<12x192xi32>
    %37 = tpu.iota {dimensions = array<i32: 1>} : vector<12x192xi32>
    %c15_i32_12 = arith.constant 15 : i32
    %38 = vector.broadcast %c15_i32_12 : i32 to vector<12x192xi32>
    %39 = arith.andi %37, %38 : vector<12x192xi32>
    %40 = arith.cmpi eq, %39, %36 : vector<12x192xi32>
    %cst_13 = arith.constant 1.000000e+00 : f32
    %cst_14 = arith.constant 0.000000e+00 : f32
    %41 = vector.broadcast %cst_13 : f32 to vector<12x192xf32>
    %42 = vector.broadcast %cst_14 : f32 to vector<12x192xf32>
    %43 = arith.select %40, %41, %42 : vector<12x192xi1>, vector<12x192xf32>
    %cst_15 = arith.constant dense<0.000000e+00> : vector<192x64xf32>
    %44 = tpu.matmul %35, %8, %cst_15 {dimension_numbers = #tpu.dot_dimension_numbers<[1], [0], [0], [1], [0, 0, 1, 1], [], []>} : vector<192x12xf32>, vector<12x64xf32>, vector<192x64xf32> -> vector<192x64xf32>
    %45 = arith.mulf %44, %27 : vector<192x64xf32>
    %cst_16 = arith.constant dense<0.000000e+00> : vector<192x12xf32>
    %46 = tpu.matmul %45, %9, %cst_16 {dimension_numbers = #tpu.dot_dimension_numbers<[1], [1], [0], [0], [0, 0, 1, 0], [], []>} : vector<192x64xf32>, vector<12x64xf32>, vector<192x12xf32> -> vector<192x12xf32>
    %c0_17 = arith.constant 0 : index
    %c0_18 = arith.constant 0 : index
    %47 = vector.load %arg3[%c0_17, %c0_18] : memref<192x12xf32, #tpu.memory_space<vmem>>, vector<192x12xf32>
    %48 = arith.addf %46, %47 : vector<192x12xf32>
    %cst_19 = arith.constant dense<0xFF800000> : vector<192xf32>
    %49 = vector.multi_reduction <maximumf>, %48, %cst_19 [1] : vector<192x12xf32> to vector<192xf32>
    %50 = vector.shape_cast %49 : vector<192xf32> to vector<192x1xf32>
    %51 = vector.broadcast %50 : vector<192x1xf32> to vector<192x12xf32>
    %52 = arith.subf %48, %51 : vector<192x12xf32>
    %53 = math.exp %52 : vector<192x12xf32>
    %cst_20 = arith.constant dense<0.000000e+00> : vector<192xf32>
    %54 = vector.multi_reduction <add>, %53, %cst_20 [1] : vector<192x12xf32> to vector<192xf32>
    %55 = vector.shape_cast %54 : vector<192xf32> to vector<192x1xf32>
    %56 = tpu.reciprocal %55 : vector<192x1xf32> -> vector<192x1xf32>
    %57 = vector.broadcast %56 : vector<192x1xf32> to vector<192x12xf32>
    %58 = arith.mulf %53, %57 : vector<192x12xf32>
    %cst_21 = arith.constant dense<0.000000e+00> : vector<192x64xf32>
    %59 = tpu.matmul %58, %10, %cst_21 {dimension_numbers = #tpu.dot_dimension_numbers<[1], [0], [0], [1], [0, 0, 1, 1], [], []>} : vector<192x12xf32>, vector<12x64xf32>, vector<192x64xf32> -> vector<192x64xf32>
    %60 = arith.mulf %59, %27 : vector<192x64xf32>
    %cst_22 = arith.constant dense<0.000000e+00> : vector<12x64xf32>
    %61 = tpu.matmul %43, %60, %cst_22 {dimension_numbers = #tpu.dot_dimension_numbers<[1], [0], [0], [1], [0, 0, 1, 1], [], []>} : vector<12x192xf32>, vector<192x64xf32>, vector<12x64xf32> -> vector<12x64xf32>
    %cst_23 = arith.constant dense<0.000000e+00> : vector<12x32xf32>
    %62 = tpu.matmul %61, %3, %cst_23 {dimension_numbers = #tpu.dot_dimension_numbers<[1], [0], [0], [1], [0, 0, 1, 1], [], []>} : vector<12x64xf32>, vector<64x32xf32>, vector<12x32xf32> -> vector<12x32xf32>
    %63 = vector.broadcast %4 : vector<1x32xf32> to vector<12x32xf32>
    %64 = arith.addf %62, %63 : vector<12x32xf32>
    %c0_24 = arith.constant 0 : index
    %c0_25 = arith.constant 0 : index
    %65 = vector.load %arg4[%c0_24, %c0_25] : memref<12x32xf32, #tpu.memory_space<vmem>>, vector<12x32xf32>
    tpu.vector_store %arg4[%c0_24, %c0_25], %64 {strides = array<i32>} : memref<12x32xf32, #tpu.memory_space<vmem>>, vector<12x32xf32>,
    return
  }
}

</mosaic_0001>

<bundles_post_ra>
// kernel: hierarchical_attention.1
= control target key start
LH: loop header
LB: loop body
LE: loop exit
PB: predicated region body
PF: predicated region fallthrough
CT: control target
= control target key end

     0   :  { %v2989_v3 = vmov 0.0   ;;  %vm49_vm0 = vcmask 261120   ;;  %v39_v15 = vlaneseq  ;;  %vm320_vm2 = vcmask 97280   ;;  %s2984_s1 = inlined_call_operand.vmem [shape: f32[33,192], index: 1, kind: input, shape index: {}]   ;;  %s2985_s0 = inlined_call_operand.vmem [shape: f32[12,32], index: 0, kind: input, shape index: {}]   ;;  %s2986_s3 = inlined_call_operand.vmem [shape: f32[192,12], index: 3, kind: input, shape index: {}]   ;;  %s2987_s2 = inlined_call_operand.vmem [shape: f32[65,32], index: 2, kind: input, shape index: {}]   ;;  %s2988_s4 = inlined_call_operand.vmem [shape: f32[12,32], index: 4, kind: output, shape index: {}]  }
   0x1   :  { %v20_v0 = vld [vmem:[%s2984_s1 + $0x8] sm:$0xff]  ;;  %v22_v1 = vld [vmem:[%s2984_s1 + $0x18] sm:$0xff]  ;;  %v19_v2 = vld [vmem:[%s2984_s1] sm:$0xff]  ;;  %120 = vmatprep.mubr.f32.mxu0 %v2989_v3  ;;  %vm393_vm4 = vcmask 1043456   ;;  %vm2119_vm5 = vmmov 1  }
   0x2   :  { %v1932_v4 = vpack.c.bf16 %v22_v1, %v20_v0  ;;  %v21_v5 = vld [vmem:[%s2984_s1 + $0x10] sm:$0xff]  ;;  %v24_v6 = vld [vmem:[%s2984_s1 + $0x28] sm:$0xff]  ;;  %v26_v7 = vld [vmem:[%s2984_s1 + $0x38] sm:$0xff]  ;;  %v2182_v16 = vshrl.u32 %v39_v15, 7  ;;  %v2187_v18 = vand.u32 127, %v39_v15 }
   0x3   :  { %v1934_v8 = vpack.c.bf16 %v21_v5, %v19_v2  ;;  %v1936_v9 = vpack.c.bf16 %v26_v7, %v24_v6  ;;  %v23_v10 = vld [vmem:[%s2984_s1 + $0x20] sm:$0xff]  ;;  %v25_v11 = vld [vmem:[%s2984_s1 + $0x30] sm:$0xff]  ;;  %v18_v14 = vld [vmem:[%s2985_s0 + $0x8] sm:$0xf] }
   0x4   :  { %1933 = vmatprep.subr.bf16.mxu0 %v1932_v4  ;;  %v1938_v12 = vpack.c.bf16 %v25_v11, %v23_v10  ;;  %v17_v13 = vld [vmem:[%s2985_s0] sm:$0xff]  ;;  %v2185_v17 = vadd.s32 32, %v2182_v16  ;;  %v237_v19 = vand.u32 15, %v2182_v16  ;;  %v41_v23 = vsub.s32 0, %v2182_v16  ;;  %vm2227_vm6 = vmpackc.low %vm393_vm4, %vm2119_vm5 }
   0x5   :  { %1935 = vmatpush1.bf16.msra.mxu0 %v1934_v8  ;;  %v1618_v24 = vld [vmem:[%s2984_s1 + $0x40] ss:$8 sm:$0x3]  ;;  %v45_v25 = vsub.s32 1, %v2182_v16  ;;  %v2203_v28 = vadd.s32 8, %v2182_v16  ;;  %v2206_v29 = vadd.s32 40, %v2182_v16 }
   0x6   :  { %1937 = vmatprep.subr.bf16.mxu0 %v1936_v9  ;;  %v241_v20 = vand.u32 15, %v2185_v17  ;;  %vm261_vm1 = vcmp.eq.s32.totalorder %v237_v19, %v2187_v18  ;;  %v42_v26 = vrot.slane %v1618_v24, %v41_v23  ;;  %v2209_v31 = vadd.s32 16, %v2182_v16  ;;  %s2120_s1 = smov 64  }
   0x7   :  { %v285_v21 = vsel %vm261_vm1, 1.0, %v2989_v3  ;;  %v46_v27 = vrot.slane %v1618_v24, %v45_v25  ;;  %v2212_v34 = vadd.s32 48, %v2182_v16  ;;  %v238_v36 = vand.u32 15, %v2203_v28 }
   0x8   :  { %vm265_vm3 = vcmp.eq.s32.totalorder %v241_v20, %v2187_v18  ;;  %v242_v37 = vand.u32 15, %v2206_v29  ;;  %v2217_v38 = vadd.s32 24, %v2182_v16  ;;  %v239_v40 = vand.u32 15, %v2209_v31 }
   0x9   :  { %1939 = vmatpush1.bf16.msra.mxu0 %v1938_v12  ;;  %v289_v22 = vsel %vm265_vm3, 1.0, %v2989_v3  ;;  %v2221_v41 = vadd.s32 56, %v2182_v16  ;;  %v243_v44 = vand.u32 15, %v2212_v34  ;;  %v2225_v45 = vadd.s32 64, %v2182_v16 }
   0xa   :  { %1803 = vmatprep.mubr.msk.f32.mxu1 %vm320_vm2, %v289_v22  ;;  %vm2232_vm7 = vcmp.eq.s32.totalorder %v238_v36, %v2187_v18  ;;  %vm2237_vm8 = vcmp.eq.s32.totalorder %v242_v37, %v2187_v18  ;;  %v240_v52 = vand.u32 15, %v2217_v38  ;;  %vm263_vm9 = vcmp.eq.s32.totalorder %v239_v40, %v2187_v18 }
   0xb   :  { %v244_v54 = vand.u32 15, %v2221_v41  ;;  %v2245_v55 = vadd.s32 72, %v2182_v16  ;;  %vm267_vm10 = vcmp.eq.s32.totalorder %v243_v44, %v2187_v18  ;;  %v245_v56 = vand.u32 15, %v2225_v45 }
   0xc   :  { %1619 = vmatmul.mubr.msk.f32.vlgmr.msra.gmra.mrb[0].mxu0 %vm49_vm0, %v17_v13  ;;  %v2252_v57 = vadd.s32 80, %v2182_v16  ;;  %v286_v58 = vsel %vm2232_vm7, 1.0, %v2989_v3  ;;  %v290_v59 = vsel %vm2237_vm8, 1.0, %v2989_v3  ;;  %v287_v60 = vsel %vm263_vm9, 1.0, %v2989_v3 }
   0xd   :  { %126 = vmatprep.mubr.f32.mxu0 %v2989_v3  ;;  %vm264_vm11 = vcmp.eq.s32.totalorder %v240_v52, %v2187_v18  ;;  %v291_v61 = vsel %vm267_vm10, 1.0, %v2989_v3  ;;  %vm268_vm12 = vcmp.eq.s32.totalorder %v244_v54, %v2187_v18  ;;  %v246_v62 = vand.u32 15, %v2245_v55 }
   0xe   :  { %v2274_v63 = vadd.s32 88, %v2182_v16  ;;  %vm269_vm13 = vcmp.eq.s32.totalorder %v245_v56, %v2187_v18  ;;  %v247_v0 = vand.u32 15, %v2252_v57  ;;  %v2280_v1 = vadd.s32 96, %v2182_v16 }
   0xf   :  { %v288_v2 = vsel %vm264_vm11, 1.0, %v2989_v3  ;;  %v292_v4 = vsel %vm268_vm12, 1.0, %v2989_v3  ;;  %v293_v5 = vsel %vm269_vm13, 1.0, %v2989_v3  ;;  %vm270_vm14 = vcmp.eq.s32.totalorder %v246_v62, %v2187_v18 }
  0x10   :  { %1620 = vmatmul.mubr.msk.f32.gmra.mrb[2].mxu0 %vm49_vm0, %v18_v14  ;;  %v248_v6 = vand.u32 15, %v2274_v63  ;;  %v2293_v7 = vadd.s32 104, %v2182_v16  ;;  %vm271_vm15 = vcmp.eq.s32.totalorder %v247_v0, %v2187_v18  ;;  %v249_v8 = vand.u32 15, %v2280_v1 }
  0x11   :  { %1797 = vmatprep.mubr.msk.f32.mxu0 %vm320_vm2, %v285_v21  ;;  %v2299_v9 = vadd.s32 112, %v2182_v16  ;;  %v294_v10 = vsel %vm270_vm14, 1.0, %v2989_v3  ;;  %v295_v11 = vsel %vm271_vm15, 1.0, %v2989_v3  ;;  %v2308_v13 = vadd.s32 120, %v2182_v16 }
  0x12   :  { %vm272_vm1 = vcmp.eq.s32.totalorder %v248_v6, %v2187_v18  ;;  %v250_v12 = vand.u32 15, %v2293_v7  ;;  %vm273_vm3 = vcmp.eq.s32.totalorder %v249_v8, %v2187_v18  ;;  %v2313_v15 = vadd.s32 128, %v2182_v16 }
  0x13   :  { %v251_v14 = vand.u32 15, %v2299_v9  ;;  %v296_v19 = vsel %vm272_vm1, 1.0, %v2989_v3  ;;  %v297_v20 = vsel %vm273_vm3, 1.0, %v2989_v3  ;;  %v252_v21 = vand.u32 15, %v2308_v13 }
  0x14   :  { %vm274_vm4 = vcmp.eq.s32.totalorder %v250_v12, %v2187_v18  ;;  %v2322_v22 = vadd.s32 136, %v2182_v16  ;;  %v253_v23 = vand.u32 15, %v2313_v15  ;;  %v2327_v24 = vadd.s32 144, %v2182_v16 }
  0x15   :  { %vm275_vm5 = vcmp.eq.s32.totalorder %v251_v14, %v2187_v18  ;;  %v298_v25 = vsel %vm274_vm4, 1.0, %v2989_v3  ;;  %v2364_v47 = vadd.s32 184, %v2182_v16  ;;  %vm635_vm15 = vcmask 523264  }
  0x16   :  { %vm277_vm7 = vcmp.eq.s32.totalorder %v253_v23, %v2187_v18  ;;  %vm1947_vm1 = vmpackc.low %vm635_vm15, %vm635_vm15  ;;  %v161_v62 = vshra.s32 %v2187_v18, 3  ;;  %vm160_vm3 = vcmp.lt.s32.totalorder %v2187_v18, 32  ;;  %v167_v6 = vshra.s32 %v2209_v31, 4 }
  0x17   :  { %v301_v36 = vsel %vm277_vm7, 1.0, %v2989_v3  ;;  %v260_v51 = vand.u32 15, %v2364_v47  ;;  %v169_v8 = vshra.s32 %v2185_v17, 4  ;;  %v170_v12 = vshra.s32 %v2206_v29, 4 }
  0x18   :  { %v171_v31 = vshra.s32 %v2212_v34, 4 }
  0x19   :  { %vm284_vm14 = vcmp.eq.s32.totalorder %v260_v51, %v2187_v18 }
  0x1a   :  { %v308_v54 = vsel %vm284_vm14, 1.0, %v2989_v3 }
  0xdf   :  { %v122_v30 = vpop.f32.mrb[0].mxu0 }
  0xe0   :  { %v123_v32 = vadd.f32 %v122_v30, %v42_v26  ;;  %v124_v33 = vpop.f32.mrb[1].mxu0  ;;  %v2336_v30 = vadd.s32 152, %v2182_v16 }
  0xe1   :  { %v125_v35 = vadd.f32 %v124_v33, %v46_v27  ;;  %v2341_v33 = vadd.s32 160, %v2182_v16 }
  0xe2   :  { %v256_v37 = vand.u32 15, %v2336_v30 }
  0xe3   :  { %v128_v39 = vpop.f32.mrb[2].mxu0  ;;  %v257_v40 = vand.u32 15, %v2341_v33 }
  0xe4   :  { %v129_v42 = vadd.f32 %v128_v39, %v42_v26  ;;  %v130_v43 = vpop.f32.mrb[3].mxu0  ;;  %v299_v26 = vsel %vm275_vm5, 1.0, %v2989_v3  ;;  %v2350_v39 = vadd.s32 168, %v2182_v16  ;;  %vm280_vm10 = vcmp.eq.s32.totalorder %v256_v37, %v2187_v18 }
  0xe5   :  { %v131_v46 = vadd.f32 %v130_v43, %v46_v27  ;;  %v254_v27 = vand.u32 15, %v2322_v22  ;;  %vm281_vm11 = vcmp.eq.s32.totalorder %v257_v40, %v2187_v18 }
  0xe6   :  { %v1940_v49 = vpack.c.bf16 %v129_v42, %v123_v32  ;;  %v2017_v50 = vpack.i.bf16 %v129_v42, %v123_v32  ;;  %v255_v32 = vand.u32 15, %v2327_v24  ;;  %v2355_v42 = vadd.s32 176, %v2182_v16 }
  0xe7   :  { %v1952_v53 = vpack.c.bf16 %v131_v46, %v125_v35  ;;  %vm278_vm8 = vcmp.eq.s32.totalorder %v254_v27, %v2187_v18  ;;  %v258_v46 = vand.u32 15, %v2350_v39 }
  0xe8   :  { %2018 = vrot.lane.b32.xlu0 %v2017_v50, %s2120_s1  ;;  %1942 = vmatprep.subr.msk.bf16.mxu0 %vm2227_vm6, %v1940_v49  ;;  %vm279_vm9 = vcmp.eq.s32.totalorder %v255_v32, %v2187_v18  ;;  %v302_v43 = vsel %vm278_vm8, 1.0, %v2989_v3  ;;  %v259_v48 = vand.u32 15, %v2355_v42  ;;  %v305_v50 = vsel %vm281_vm11, 1.0, %v2989_v3 }
  0xe9   :  { %2010 = vmatprep.subr.msk.bf16.mxu1 %vm2227_vm6, %v1940_v49  ;;  %1945 = vmatpush3.bf16.msk.msra.mxu0 %vm2227_vm6, %v1940_v49  ;;  %v303_v44 = vsel %vm279_vm9, 1.0, %v2989_v3  ;;  %vm282_vm12 = vcmp.eq.s32.totalorder %v258_v46, %v2187_v18  ;;  %v173_v32 = vshra.s32 %v2225_v45, 4  ;;  %v174_v45 = vshra.s32 %v2245_v55, 4 }
  0xea   :  { %2011 = vmatpush3.bf16.msk.msra.mxu1 %vm2227_vm6, %v1940_v49  ;;  %v304_v49 = vsel %vm280_vm10, 1.0, %v2989_v3  ;;  %vm283_vm13 = vcmp.eq.s32.totalorder %v259_v48, %v2187_v18  ;;  %v306_v52 = vsel %vm282_vm12, 1.0, %v2989_v3  ;;  %v175_v48 = vshra.s32 %v2252_v57, 4 }
  0xeb   :  { %1954 = vmatprep.subr.msk.bf16.mxu1 %vm2227_vm6, %v1952_v53  ;;  %v176_v57 = vshra.s32 %v2274_v63, 4 }
  0xec   :  { %1798 = vmatmul.mubr.msk.f32.vlgmr.msra.gmra.mrb[4].mxu0 %vm320_vm2, %v286_v58 }
  0xed   :  { %1804 = vmatmul.mubr.msk.f32.vlgmr.msra.gmra.mrb[0].mxu1 %vm320_vm2, %v290_v59  ;;  %1800 = vmatprep.mubr.msk.f32.mxu0 %vm320_vm2, %v287_v60 }
  0xee   :  { %1957 = vmatpush3.bf16.msk.msra.mxu1 %vm2227_vm6, %v1952_v53  ;;  %1806 = vmatprep.mubr.msk.f32.mxu1 %vm320_vm2, %v291_v61  ;;  %vm276_vm6 = vcmp.eq.s32.totalorder %v252_v21, %v2187_v18  ;;  %v307_v53 = vsel %vm283_vm13, 1.0, %v2989_v3  ;;  %v162_v61 = vshra.s32 %v2187_v18, 2 }
  0xef   :  { %v300_v35 = vsel %vm276_vm6, 1.0, %v2989_v3 }
  0xf0   :  { %1801 = vmatmul.mubr.msk.f32.gmra.mrb[6].mxu0 %vm320_vm2, %v288_v2  ;;  %v1621_v0 = vadd.s32 4294967292, %v162_v61  ;;  %v165_v2 = vshra.s32 %v2182_v16, 4 }
  0xf1   :  { %1807 = vmatmul.mubr.msk.f32.gmra.mrb[2].mxu1 %vm320_vm2, %v292_v4 }
  0xf2   :  { %1809 = vmatprep.mubr.msk.f32.mxu1 %vm320_vm2, %v293_v5  ;;  %v2390_v4 = vsel %vm160_vm3, %v161_v62, %v1621_v0  ;;  %v166_v5 = vshra.s32 %v2203_v28, 4  ;;  %v179_v62 = vshra.s32 %v2299_v9, 4  ;;  %v180_v9 = vshra.s32 %v2308_v13, 4 }
  0xf3   :  { %vm189_vm4 = vcmp.eq.s32.totalorder %v165_v2, %v2390_v4  ;;  %vm191_vm6 = vcmp.eq.s32.totalorder %v167_v6, %v2390_v4  ;;  %vm193_vm7 = vcmp.eq.s32.totalorder %v169_v8, %v2390_v4  ;;  %vm194_vm9 = vcmp.eq.s32.totalorder %v170_v12, %v2390_v4 }
  0xf4   :  { %vm190_vm5 = vcmp.eq.s32.totalorder %v166_v5, %v2390_v4  ;;  %v2411_v21 = vsel %vm191_vm6, 1.0, %v2989_v3  ;;  %vm195_vm10 = vcmp.eq.s32.totalorder %v171_v31, %v2390_v4  ;;  %v2428_v40 = vsel %vm194_vm9, 1.0, %v2989_v3 }
  0xf5   :  { %1810 = vmatmul.mubr.msk.f32.gmra.mrb[4].mxu1 %vm320_vm2, %v294_v10  ;;  %v168_v10 = vshra.s32 %v2217_v38, 4  ;;  %v2404_v14 = vsel %vm190_vm5, 1.0, %v2989_v3  ;;  %v2434_v46 = vsel %vm195_vm10, 1.0, %v2989_v3  ;;  %vm197_vm12 = vcmp.eq.s32.totalorder %v173_v32, %v2390_v4 }
  0xf6   :  { %1812 = vmatprep.mubr.msk.f32.mxu1 %vm320_vm2, %v295_v11  ;;  %v2399_v11 = vsel %vm189_vm4, 1.0, %v2989_v3  ;;  %vm198_vm13 = vcmp.eq.s32.totalorder %v174_v45, %v2390_v4  ;;  %v2449_v55 = vsel %vm197_vm12, 1.0, %v2989_v3  ;;  %vm199_vm14 = vcmp.eq.s32.totalorder %v175_v48, %v2390_v4 }
  0xf7   :  { %vm192_vm8 = vcmp.eq.s32.totalorder %v168_v10, %v2390_v4  ;;  %v2463_v63 = vsel %vm199_vm14, 1.0, %v2989_v3  ;;  %vm203_vm5 = vcmp.eq.s32.totalorder %v179_v62, %v2390_v4  ;;  %v181_v10 = vshra.s32 %v2313_v15, 4 }
  0xf8   :  { %v2420_v34 = vsel %vm192_vm8, 1.0, %v2989_v3  ;;  %vm204_vm6 = vcmp.eq.s32.totalorder %v180_v9, %v2390_v4  ;;  %v2491_v13 = vsel %vm203_vm5, 1.0, %v2989_v3  ;;  %v182_v15 = vshra.s32 %v2322_v22, 4 }
  0xf9   :  { %1813 = vmatmul.mubr.msk.f32.gmra.mrb[6].mxu1 %vm320_vm2, %v296_v19  ;;  %v187_v45 = vshra.s32 %v2355_v42, 4  ;;  %v188_v42 = vshra.s32 %v2364_v47, 4  ;;  %vm1612_vm5 = vcmask 257024  }
  0xfa   :  { %1815 = vmatprep.mubr.msk.f32.mxu1 %vm320_vm2, %v297_v20  ;;  %vm206_vm8 = vcmp.eq.s32.totalorder %v182_v15, %v2390_v4  ;;  %v608_v15 = vld [vmem:[%s2986_s3 + $0x10] sm:$0xff] }
  0xfb   :  { %vm212_vm14 = vcmp.eq.s32.totalorder %v188_v42, %v2390_v4 }
  0xfd   :  { %1816 = vmatmul.mubr.msk.f32.gmra.mrb[8].mxu1 %vm320_vm2, %v298_v25  ;;  %v2416_v25 = vsel %vm193_vm7, 1.0, %v2989_v3  ;;  %vm205_vm7 = vcmp.eq.s32.totalorder %v181_v10, %v2390_v4 }
  0xfe   :  { %1818 = vmatprep.mubr.msk.f32.mxu1 %vm320_vm2, %v299_v26  ;;  %v172_v26 = vshra.s32 %v2221_v41, 4  ;;  %v2505_v22 = vsel %vm205_vm7, 1.0, %v2989_v3 }
 0x100   :  { %vm196_vm11 = vcmp.eq.s32.totalorder %v172_v26, %v2390_v4  ;;  %v2499_v26 = vsel %vm204_vm6, 1.0, %v2989_v3 }
 0x101   :  { %1819 = vmatmul.mubr.msk.f32.gmra.mrb[10].mxu1 %vm320_vm2, %v300_v35  ;;  %v2443_v51 = vsel %vm196_vm11, 1.0, %v2989_v3 }
 0x102   :  { %1821 = vmatprep.mubr.msk.f32.mxu1 %vm320_vm2, %v301_v36 }
 0x105   :  { %1822 = vmatmul.mubr.msk.f32.gmra.mrb[12].mxu1 %vm320_vm2, %v302_v43 }
 0x106   :  { %1824 = vmatprep.mubr.msk.f32.mxu1 %vm320_vm2, %v303_v44 }
 0x109   :  { %1825 = vmatmul.mubr.msk.f32.gmra.mrb[14].mxu1 %vm320_vm2, %v304_v49 }
 0x10a   :  { %1827 = vmatprep.mubr.msk.f32.mxu1 %vm320_vm2, %v305_v50 }
 0x10d   :  { %1828 = vmatmul.mubr.msk.f32.gmra.mrb[16].mxu1 %vm320_vm2, %v306_v52 }
 0x10e   :  { %1830 = vmatprep.mubr.msk.f32.mxu1 %vm320_vm2, %v307_v53 }
 0x111   :  { %1831 = vmatmul.mubr.msk.f32.gmra.mrb[18].mxu1 %vm320_vm2, %v308_v54  ;;  %v177_v54 = vshra.s32 %v2280_v1, 4  ;;  %v178_v1 = vshra.s32 %v2293_v7, 4 }
 0x113   :  { %vm201_vm3 = vcmp.eq.s32.totalorder %v177_v54, %v2390_v4  ;;  %vm202_vm4 = vcmp.eq.s32.totalorder %v178_v1, %v2390_v4  ;;  %v2551_v1 = vsel %vm212_vm14, 1.0, %v2989_v3 }
 0x114   :  { %v2477_v7 = vsel %vm201_vm3, 1.0, %v2989_v3  ;;  %v2485_v31 = vsel %vm202_vm4, 1.0, %v2989_v3 }
 0x15a   :  { %v2019_v56 = vpop.permute.xlu0 %2018 }
 0x15b   :  { %v2021_v58 = vunpack.i.h.bf16 %v2019_v56  ;;  %v2020_v59 = vunpack.i.l.bf16 %v2019_v56 }
 0x15d   :  { %v1946_v60 = vpack.c.bf16 %v2021_v58, %v2020_v59  ;;  %v2457_v59 = vsel %vm198_vm13, 1.0, %v2989_v3  ;;  %vm211_vm13 = vcmp.eq.s32.totalorder %v187_v45, %v2390_v4 }
 0x15f   :  { %1948 = vmatprep.subr.msk.bf16.mxu0 %vm1947_vm1, %v1946_v60 }
 0x160   :  { %1951 = vmatpush3.bf16.xpose.msk.msra.mxu0 %vm1947_vm1, %v1946_v60  ;;  %vm200_vm1 = vcmp.eq.s32.totalorder %v176_v57, %v2390_v4 }
 0x161   :  { %v2471_v5 = vsel %vm200_vm1, 1.0, %v2989_v3 }
 0x1bf   :  { %v1799_v19 = vpop.f32.mrb[4].mxu0 }
 0x1c0   :  { %v463_v17 = vpop.f32.mrb[5].mxu0  ;;  %v1805_v20 = vpop.f32.mrb[0].mxu1  ;;  %v583_v29 = vmul.f32 %v1799_v19, %v2404_v14 }
 0x1c1   :  { %v582_v38 = vmul.f32 %v463_v17, %v2399_v11  ;;  %v483_v23 = vpop.f32.mrb[1].mxu1  ;;  %v587_v49 = vmul.f32 %v1805_v20, %v2428_v40 }
 0x1c2   :  { %v586_v41 = vmul.f32 %v483_v23, %v2416_v25 }
 0x1c3   :  { %v1802_v27 = vpop.f32.mrb[6].mxu0  ;;  %1837 = vmatprep.mubr.msk.f32.mxu0 %vm635_vm15, %v582_v38  ;;  %v183_v38 = vshra.s32 %v2327_v24, 4  ;;  %v184_v24 = vshra.s32 %v2336_v30, 4 }
 0x1c4   :  { %v473_v35 = vpop.f32.mrb[7].mxu0  ;;  %1838 = vmatmul.mubr.msk.f32.vlgmr.msra.gmra.mrb[8].mxu0 %vm635_vm15, %v583_v29  ;;  %v1808_v36 = vpop.f32.mrb[2].mxu1  ;;  %v585_v44 = vmul.f32 %v1802_v27, %v2420_v34 }
 0x1c5   :  { %v584_v37 = vmul.f32 %v473_v35, %v2411_v21  ;;  %v493_v43 = vpop.f32.mrb[3].mxu1  ;;  %v589_v56 = vmul.f32 %v1808_v36, %v2443_v51  ;;  %vm207_vm9 = vcmp.eq.s32.totalorder %v183_v38, %v2390_v4  ;;  %v185_v35 = vshra.s32 %v2341_v33, 4 }
 0x1c6   :  { %v588_v52 = vmul.f32 %v493_v43, %v2434_v46  ;;  %vm208_vm10 = vcmp.eq.s32.totalorder %v184_v24, %v2390_v4  ;;  %v2519_v30 = vsel %vm207_vm9, 1.0, %v2989_v3  ;;  %v186_v33 = vshra.s32 %v2350_v39, 4 }
 0x1c7   :  { %1840 = vmatprep.mubr.msk.f32.mxu0 %vm635_vm15, %v584_v37  ;;  %vm209_vm11 = vcmp.eq.s32.totalorder %v185_v35, %v2390_v4 }
 0x1c8   :  { %1841 = vmatmul.mubr.msk.f32.gmra.mrb[10].mxu0 %vm635_vm15, %v585_v44  ;;  %v1811_v50 = vpop.f32.mrb[4].mxu1  ;;  %vm210_vm12 = vcmp.eq.s32.totalorder %v186_v33, %v2390_v4  ;;  %v2533_v39 = vsel %vm209_vm11, 1.0, %v2989_v3  ;;  %v607_v4 = vld [vmem:[%s2986_s3 + $0x8] sm:$0xff] }
 0x1c9   :  { %1843 = vmatprep.mubr.msk.f32.mxu0 %vm635_vm15, %v586_v41  ;;  %v503_v53 = vpop.f32.mrb[5].mxu1  ;;  %v591_v0 = vmul.f32 %v1811_v50, %v2457_v59  ;;  %v2513_v41 = vsel %vm206_vm8, 1.0, %v2989_v3  ;;  %v2527_v50 = vsel %vm208_vm10, 1.0, %v2989_v3 }
 0x1ca   :  { %v590_v60 = vmul.f32 %v503_v53, %v2449_v55 }
 0x1cc   :  { %1844 = vmatmul.mubr.msk.f32.gmra.mrb[12].mxu0 %vm635_vm15, %v587_v49  ;;  %v1814_v58 = vpop.f32.mrb[6].mxu1 }
 0x1cd   :  { %1846 = vmatprep.mubr.msk.f32.mxu0 %vm635_vm15, %v588_v52  ;;  %v513_v61 = vpop.f32.mrb[7].mxu1  ;;  %v593_v12 = vmul.f32 %v1814_v58, %v2471_v5 }
 0x1ce   :  { %v592_v6 = vmul.f32 %v513_v61, %v2463_v63  ;;  %v2546_v61 = vsel %vm211_vm13, 1.0, %v2989_v3 }
 0x1d0   :  { %1847 = vmatmul.mubr.msk.f32.gmra.mrb[14].mxu0 %vm635_vm15, %v589_v56  ;;  %v1817_v2 = vpop.f32.mrb[8].mxu1  ;;  %v2540_v56 = vsel %vm210_vm12, 1.0, %v2989_v3 }
 0x1d1   :  { %1849 = vmatprep.mubr.msk.f32.mxu0 %vm635_vm15, %v590_v60  ;;  %v523_v8 = vpop.f32.mrb[9].mxu1  ;;  %v595_v23 = vmul.f32 %v1817_v2, %v2485_v31  ;;  %v606_v2 = vld [vmem:[%s2986_s3] sm:$0xff] }
 0x1d2   :  { %v594_v17 = vmul.f32 %v523_v8, %v2477_v7 }
 0x1d4   :  { %1850 = vmatmul.mubr.msk.f32.gmra.mrb[16].mxu0 %vm635_vm15, %v591_v0  ;;  %v1820_v19 = vpop.f32.mrb[10].mxu1 }
 0x1d5   :  { %1852 = vmatprep.mubr.msk.f32.mxu0 %vm635_vm15, %v592_v6  ;;  %v533_v20 = vpop.f32.mrb[11].mxu1  ;;  %v597_v36 = vmul.f32 %v1820_v19, %v2499_v26 }
 0x1d6   :  { %v596_v27 = vmul.f32 %v533_v20, %v2491_v13 }
 0x1d8   :  { %1853 = vmatmul.mubr.msk.f32.gmra.mrb[18].mxu0 %vm635_vm15, %v593_v12  ;;  %v1823_v29 = vpop.f32.mrb[12].mxu1  ;;  %v609_v12 = vld [vmem:[%s2986_s3 + $0x18] sm:$0xff] }
 0x1d9   :  { %1855 = vmatprep.mubr.msk.f32.mxu0 %vm635_vm15, %v594_v17  ;;  %v543_v32 = vpop.f32.mrb[13].mxu1  ;;  %v599_v48 = vmul.f32 %v1823_v29, %v2513_v41 }
 0x1da   :  { %v598_v43 = vmul.f32 %v543_v32, %v2505_v22  ;;  %v611_v32 = vld [vmem:[%s2986_s3 + $0x28] sm:$0xff] }
 0x1dc   :  { %1856 = vmatmul.mubr.msk.f32.gmra.mrb[20].mxu0 %vm635_vm15, %v595_v23  ;;  %v1826_v37 = vpop.f32.mrb[14].mxu1 }
 0x1dd   :  { %1858 = vmatprep.mubr.msk.f32.mxu0 %vm635_vm15, %v596_v27  ;;  %v553_v44 = vpop.f32.mrb[15].mxu1  ;;  %v601_v57 = vmul.f32 %v1826_v37, %v2527_v50 }
 0x1de   :  { %v600_v52 = vmul.f32 %v553_v44, %v2519_v30 }
 0x1e0   :  { %1859 = vmatmul.mubr.msk.f32.gmra.mrb[22].mxu0 %vm635_vm15, %v597_v36  ;;  %v1829_v49 = vpop.f32.mrb[16].mxu1 }
 0x1e1   :  { %1861 = vmatprep.mubr.msk.f32.mxu0 %vm635_vm15, %v598_v43  ;;  %v563_v53 = vpop.f32.mrb[17].mxu1  ;;  %v603_v47 = vmul.f32 %v1829_v49, %v2540_v56  ;;  %v610_v43 = vld [vmem:[%s2986_s3 + $0x20] sm:$0xff]  ;;  %v613_v49 = vld [vmem:[%s2986_s3 + $0x38] sm:$0xff] }
 0x1e2   :  { %v602_v58 = vmul.f32 %v563_v53, %v2533_v39 }
 0x1e4   :  { %1862 = vmatmul.mubr.msk.f32.gmra.mrb[24].mxu0 %vm635_vm15, %v599_v48  ;;  %v1832_v54 = vpop.f32.mrb[18].mxu1 }
 0x1e5   :  { %1864 = vmatprep.mubr.msk.f32.mxu0 %vm635_vm15, %v600_v52  ;;  %v573_v60 = vpop.f32.mrb[19].mxu1  ;;  %v605_v0 = vmul.f32 %v1832_v54, %v2551_v1  ;;  %v616_v54 = vld [vmem:[%s2986_s3 + $0x50] sm:$0xff] }
 0x1e6   :  { %v604_v62 = vmul.f32 %v573_v60, %v2546_v61 }
 0x1e8   :  { %1865 = vmatmul.mubr.msk.f32.gmra.mrb[26].mxu0 %vm635_vm15, %v601_v57 }
 0x1e9   :  { %1867 = vmatprep.mubr.msk.f32.mxu0 %vm635_vm15, %v602_v58  ;;  %v612_v58 = vld [vmem:[%s2986_s3 + $0x30] sm:$0xff] }
 0x1ec   :  { %1868 = vmatmul.mubr.msk.f32.gmra.mrb[28].mxu0 %vm635_vm15, %v603_v47 }
 0x1ed   :  { %1870 = vmatprep.mubr.msk.f32.mxu0 %vm635_vm15, %v604_v62 }
 0x1f0   :  { %1871 = vmatmul.mubr.msk.f32.gmra.mrb[30].mxu0 %vm635_vm15, %v605_v0 }
 0x297   :  { %v1839_v6 = vpop.f32.mrb[8].mxu0 }
 0x298   :  { %v2565_v8 = vadd.f32 %v1839_v6, %v607_v4  ;;  %v778_v9 = vpop.f32.mrb[9].mxu0  ;;  %v614_v6 = vld [vmem:[%s2986_s3 + $0x40] sm:$0xff] }
 0x299   :  { %v2567_v10 = vadd.f32 %v778_v9, %v606_v2  ;;  %v618_v2 = vld [vmem:[%s2986_s3 + $0x60] sm:$0xff] }
 0x29a   :  { %v900_v19 = vsel %vm320_vm2, %v2565_v8, -inf }
 0x29b   :  { %901 = vmax.xlane.f32.xlu1 %v900_v19  ;;  %v1842_v17 = vpop.f32.mrb[10].mxu0  ;;  %v897_v20 = vsel %vm320_vm2, %v2567_v10, -inf }
 0x29c   :  { %v2579_v38 = vadd.f32 %v1842_v17, %v609_v12  ;;  %898 = vmax.xlane.f32.xlu0 %v897_v20  ;;  %v788_v23 = vpop.f32.mrb[11].mxu0 }
 0x29d   :  { %v2581_v29 = vadd.f32 %v788_v23, %v608_v15  ;;  %v620_v23 = vld [vmem:[%s2986_s3 + $0x70] sm:$0xff] }
 0x29e   :  { %v906_v27 = vsel %vm320_vm2, %v2579_v38, -inf }
 0x29f   :  { %907 = vmax.xlane.f32.xlu1 %v906_v27  ;;  %v1845_v24 = vpop.f32.mrb[12].mxu0  ;;  %v903_v37 = vsel %vm320_vm2, %v2581_v29, -inf  ;;  %v615_v27 = vld [vmem:[%s2986_s3 + $0x48] sm:$0xff] }
 0x2a0   :  { %v798_v35 = vpop.f32.mrb[13].mxu0  ;;  %v2588_v36 = vadd.f32 %v1845_v24, %v611_v32 }
 0x2a1   :  { %v2595_v45 = vadd.f32 %v798_v35, %v610_v43 }
 0x2a2   :  { %v912_v48 = vsel %vm320_vm2, %v2588_v36, -inf }
 0x2a3   :  { %904 = vmax.xlane.f32.xlu1 %v903_v37  ;;  %v1848_v44 = vpop.f32.mrb[14].mxu0  ;;  %v909_v57 = vsel %vm320_vm2, %v2595_v45, -inf }
 0x2a4   :  { %v808_v33 = vpop.f32.mrb[15].mxu0  ;;  %v2602_v42 = vadd.f32 %v1848_v44, %v613_v49 }
 0x2a5   :  { %v2614_v0 = vadd.f32 %v808_v33, %v612_v58  ;;  %v622_v33 = vld [vmem:[%s2986_s3 + $0x80] sm:$0xff] }
 0x2a6   :  { %v918_v4 = vsel %vm320_vm2, %v2602_v42, -inf }
 0x2a7   :  { %913 = vmax.xlane.f32.xlu1 %v912_v48  ;;  %v1851_v52 = vpop.f32.mrb[16].mxu0  ;;  %v915_v15 = vsel %vm320_vm2, %v2614_v0, -inf  ;;  %v617_v48 = vld [vmem:[%s2986_s3 + $0x58] sm:$0xff] }
 0x2a8   :  { %v818_v53 = vpop.f32.mrb[17].mxu0  ;;  %v2642_v43 = vadd.f32 %v1851_v52, %v615_v27  ;;  %v621_v27 = vld [vmem:[%s2986_s3 + $0x78] sm:$0xff] }
 0x2a9   :  { %v2628_v20 = vadd.f32 %v818_v53, %v614_v6 }
 0x2aa   :  { %v924_v58 = vsel %vm320_vm2, %v2642_v43, -inf }
 0x2ab   :  { %v1854_v60 = vpop.f32.mrb[18].mxu0  ;;  %910 = vmax.xlane.f32.xlu1 %v909_v57  ;;  %v921_v44 = vsel %vm320_vm2, %v2628_v20, -inf }
 0x2ac   :  { %v828_v47 = vpop.f32.mrb[19].mxu0 }
 0x2ad   :  { %v2612_v62 = vadd.f32 %v828_v47, %v616_v54  ;;  %v2656_v54 = vadd.f32 %v1854_v60, %v617_v48  ;;  %v624_v47 = vld [vmem:[%s2986_s3 + $0x90] sm:$0xff] }
 0x2af   :  { %v1857_v9 = vpop.f32.mrb[20].mxu0  ;;  %919 = vmax.xlane.f32.xlu1 %v918_v4  ;;  %v927_v12 = vsel %vm320_vm2, %v2612_v62, -inf  ;;  %v619_v4 = vld [vmem:[%s2986_s3 + $0x68] sm:$0xff] }
 0x2b0   :  { %v838_v19 = vpop.f32.mrb[21].mxu0  ;;  %928 = vmax.xlane.f32.xlu0 %v927_v12 }
 0x2b1   :  { %v2626_v17 = vadd.f32 %v838_v19, %v618_v2  ;;  %v2670_v19 = vadd.f32 %v1857_v9, %v619_v4 }
 0x2b3   :  { %v1860_v32 = vpop.f32.mrb[22].mxu0  ;;  %916 = vmax.xlane.f32.xlu1 %v915_v15  ;;  %v933_v24 = vsel %vm320_vm2, %v2626_v17, -inf  ;;  %v930_v15 = vsel %vm320_vm2, %v2656_v54, -inf  ;;  %v936_v48 = vsel %vm320_vm2, %v2670_v19, -inf }
 0x2b4   :  { %v848_v35 = vpop.f32.mrb[23].mxu0  ;;  %934 = vmax.xlane.f32.xlu0 %v933_v24 }
 0x2b5   :  { %v2640_v37 = vadd.f32 %v848_v35, %v620_v23  ;;  %v626_v23 = vld [vmem:[%s2986_s3 + $0xa0] sm:$0xff] }
 0x2b7   :  { %v1863_v49 = vpop.f32.mrb[24].mxu0  ;;  %922 = vmax.xlane.f32.xlu1 %v921_v44  ;;  %v939_v53 = vsel %vm320_vm2, %v2640_v37, -inf }
 0x2b8   :  { %v858_v57 = vpop.f32.mrb[25].mxu0  ;;  %940 = vmax.xlane.f32.xlu0 %v939_v53  ;;  %v628_v53 = vld [vmem:[%s2986_s3 + $0xb0] sm:$0xff] }
 0x2b9   :  { %v2654_v52 = vadd.f32 %v858_v57, %v622_v33  ;;  %v2684_v33 = vadd.f32 %v1860_v32, %v621_v27  ;;  %v623_v57 = vld [vmem:[%s2986_s3 + $0x88] sm:$0xff] }
 0x2bb   :  { %v1866_v2 = vpop.f32.mrb[26].mxu0  ;;  %925 = vmax.xlane.f32.xlu1 %v924_v58  ;;  %v945_v6 = vsel %vm320_vm2, %v2654_v52, -inf }
 0x2bc   :  { %v868_v12 = vpop.f32.mrb[27].mxu0  ;;  %946 = vmax.xlane.f32.xlu0 %v945_v6  ;;  %v2698_v6 = vadd.f32 %v1863_v49, %v623_v57  ;;  %v627_v49 = vld [vmem:[%s2986_s3 + $0xa8] sm:$0xff] }
 0x2bd   :  { %v2668_v60 = vadd.f32 %v868_v12, %v624_v47  ;;  %v942_v12 = vsel %vm320_vm2, %v2684_v33, -inf }
 0x2bf   :  { %v1869_v24 = vpop.f32.mrb[28].mxu0  ;;  %931 = vmax.xlane.f32.xlu1 %v930_v15  ;;  %v951_v35 = vsel %vm320_vm2, %v2668_v60, -inf  ;;  %v625_v15 = vld [vmem:[%s2986_s3 + $0x98] sm:$0xff] }
 0x2c0   :  { %v878_v44 = vpop.f32.mrb[29].mxu0  ;;  %952 = vmax.xlane.f32.xlu0 %v951_v35  ;;  %v2707_v27 = vadd.f32 %v1866_v2, %v625_v15  ;;  %v948_v35 = vsel %vm320_vm2, %v2698_v6, -inf }
 0x2c1   :  { %v2682_v9 = vadd.f32 %v878_v44, %v626_v23  ;;  %v2714_v44 = vadd.f32 %v1869_v24, %v627_v49 }
 0x2c3   :  { %v1872_v58 = vpop.f32.mrb[30].mxu0  ;;  %937 = vmax.xlane.f32.xlu1 %v936_v48  ;;  %v957_v47 = vsel %vm320_vm2, %v2682_v9, -inf  ;;  %v954_v48 = vsel %vm320_vm2, %v2707_v27, -inf  ;;  %v960_v57 = vsel %vm320_vm2, %v2714_v44, -inf }
 0x2c4   :  { %v888_v4 = vpop.f32.mrb[31].mxu0  ;;  %958 = vmax.xlane.f32.xlu0 %v957_v47 }
 0x2c5   :  { %v2696_v32 = vadd.f32 %v888_v4, %v628_v53  ;;  %v629_v53 = vld [vmem:[%s2986_s3 + $0xb8] sm:$0xff] }
 0x2c6   :  { %v2721_v2 = vadd.f32 %v1872_v58, %v629_v53 }
 0x2c7   :  { %943 = vmax.xlane.f32.xlu1 %v942_v12  ;;  %v963_v23 = vsel %vm320_vm2, %v2696_v32, -inf }
 0x2c8   :  { %964 = vmax.xlane.f32.xlu0 %v963_v23  ;;  %v966_v47 = vsel %vm320_vm2, %v2721_v2, -inf }
 0x2cb   :  { %949 = vmax.xlane.f32.xlu1 %v948_v35 }
 0x2cf   :  { %955 = vmax.xlane.f32.xlu1 %v954_v48 }
 0x2d3   :  { %961 = vmax.xlane.f32.xlu1 %v960_v57 }
 0x2d7   :  { %967 = vmax.xlane.f32.xlu1 %v966_v47 }
 0x328   :  { %v902_v24 = vpop.xlane.xlu1 %901 }
 0x329   :  { %v970_v4 = vsub.f32 %v2565_v8, %v902_v24  ;;  %v899_v12 = vpop.xlane.xlu0 %898 }
 0x32a   :  { %v969_v15 = vsub.f32 %v2567_v10, %v899_v12 }
 0x32b   :  { %v995_v23 = vmul.f32 1.442695, %v970_v4 }
 0x32c   :  { %v993_v35 = vmul.f32 1.442695, %v969_v15  ;;  %v908_v49 = vpop.xlane.xlu1 %907 }
 0x32d   :  { %2022 = vpow2.f32 %v995_v23  ;;  %v972_v58 = vsub.f32 %v2579_v38, %v908_v49 }
 0x32e   :  { %2024 = vpow2.f32 %v993_v35 }
 0x32f   :  { %v999_v48 = vmul.f32 1.442695, %v972_v58 }
 0x330   :  { %v905_v53 = vpop.xlane.xlu1 %904 }
 0x331   :  { %2026 = vpow2.f32 %v999_v48  ;;  %v971_v57 = vsub.f32 %v2581_v29, %v905_v53 }
 0x333   :  { %v997_v3 = vmul.f32 1.442695, %v971_v57 }
 0x334   :  { %v914_v47 = vpop.xlane.xlu1 %913 }
 0x335   :  { %2028 = vpow2.f32 %v997_v3  ;;  %v974_v8 = vsub.f32 %v2588_v36, %v914_v47 }
 0x337   :  { %v2732_v24 = vpop.eup %2022  ;;  %v1003_v10 = vmul.f32 1.442695, %v974_v8 }
 0x338   :  { %v2734_v4 = vpop.eup %2024  ;;  %v911_v12 = vpop.xlane.xlu1 %910  ;;  %v1044_v38 = vsel %vm320_vm2, %v2732_v24, 0.0 }
 0x339   :  { %2030 = vpow2.f32 %v1003_v10  ;;  %v973_v15 = vsub.f32 %v2595_v45, %v911_v12  ;;  %1045 = vadd.xlane.f32.xlu1 %v1044_v38  ;;  %v1041_v29 = vsel %vm320_vm2, %v2734_v4, 0.0 }
 0x33a   :  { %1042 = vadd.xlane.f32.xlu0 %v1041_v29 }
 0x33b   :  { %v2741_v3 = vpop.eup %2026  ;;  %v1001_v36 = vmul.f32 1.442695, %v973_v15 }
 0x33c   :  { %v920_v23 = vpop.xlane.xlu1 %919  ;;  %v1050_v35 = vsel %vm320_vm2, %v2741_v3, 0.0 }
 0x33d   :  { %2032 = vpow2.f32 %v1001_v36  ;;  %v976_v49 = vsub.f32 %v2602_v42, %v920_v23  ;;  %v929_v58 = vpop.xlane.xlu0 %928  ;;  %1051 = vadd.xlane.f32.xlu1 %v1050_v35 }
 0x33e   :  { %v979_v12 = vsub.f32 %v2612_v62, %v929_v58 }
 0x33f   :  { %v2746_v48 = vpop.eup %2028  ;;  %v1007_v45 = vmul.f32 1.442695, %v976_v49 }
 0x340   :  { %v917_v53 = vpop.xlane.xlu1 %916  ;;  %v1047_v57 = vsel %vm320_vm2, %v2746_v48, 0.0  ;;  %v1013_v35 = vmul.f32 1.442695, %v979_v12 }
 0x341   :  { %2034 = vpow2.f32 %v1007_v45  ;;  %v975_v47 = vsub.f32 %v2614_v0, %v917_v53  ;;  %v935_v8 = vpop.xlane.xlu0 %934  ;;  %1048 = vadd.xlane.f32.xlu0 %v1047_v57 }
 0x342   :  { %v981_v0 = vsub.f32 %v2626_v17, %v935_v8 }
 0x343   :  { %v2751_v10 = vpop.eup %2030  ;;  %v1005_v38 = vmul.f32 1.442695, %v975_v47 }
 0x344   :  { %v923_v42 = vpop.xlane.xlu1 %922  ;;  %v1056_v15 = vsel %vm320_vm2, %v2751_v10, 0.0 }
 0x345   :  { %2036 = vpow2.f32 %v1005_v38  ;;  %v977_v29 = vsub.f32 %v2628_v20, %v923_v42  ;;  %v941_v36 = vpop.xlane.xlu0 %940  ;;  %1057 = vadd.xlane.f32.xlu1 %v1056_v15  ;;  %v1017_v20 = vmul.f32 1.442695, %v981_v0 }
 0x346   :  { %v983_v47 = vsub.f32 %v2640_v37, %v941_v36 }
 0x347   :  { %v2757_v23 = vpop.eup %2032  ;;  %v1009_v49 = vmul.f32 1.442695, %v977_v29 }
 0x348   :  { %v926_v45 = vpop.xlane.xlu1 %925  ;;  %v1053_v62 = vsel %vm320_vm2, %v2757_v23, 0.0 }
 0x349   :  { %2038 = vpow2.f32 %v1009_v49  ;;  %v978_v58 = vsub.f32 %v2642_v43, %v926_v45  ;;  %v947_v53 = vpop.xlane.xlu0 %946  ;;  %1054 = vadd.xlane.f32.xlu0 %v1053_v62  ;;  %v1021_v43 = vmul.f32 1.442695, %v983_v47 }
 0x34a   :  { %2040 = vpow2.f32 %v1013_v35  ;;  %v985_v29 = vsub.f32 %v2654_v52, %v947_v53 }
 0x34b   :  { %v2763_v57 = vpop.eup %2034  ;;  %v1011_v38 = vmul.f32 1.442695, %v978_v58 }
 0x34c   :  { %v932_v12 = vpop.xlane.xlu1 %931  ;;  %v1062_v17 = vsel %vm320_vm2, %v2763_v57, 0.0 }
 0x34d   :  { %2042 = vpow2.f32 %v1011_v38  ;;  %v980_v8 = vsub.f32 %v2656_v54, %v932_v12  ;;  %v953_v42 = vpop.xlane.xlu0 %952  ;;  %1063 = vadd.xlane.f32.xlu1 %v1062_v17  ;;  %v1025_v54 = vmul.f32 1.442695, %v985_v29 }
 0x34e   :  { %2044 = vpow2.f32 %v1017_v20  ;;  %v987_v62 = vsub.f32 %v2668_v60, %v953_v42 }
 0x34f   :  { %v2769_v15 = vpop.eup %2036  ;;  %v1015_v35 = vmul.f32 1.442695, %v980_v8 }
 0x350   :  { %v938_v0 = vpop.xlane.xlu1 %937  ;;  %v1059_v37 = vsel %vm320_vm2, %v2769_v15, 0.0  ;;  %v1029_v38 = vmul.f32 1.442695, %v987_v62 }
 0x351   :  { %2046 = vpow2.f32 %v1015_v35  ;;  %v982_v36 = vsub.f32 %v2670_v19, %v938_v0  ;;  %1060 = vadd.xlane.f32.xlu0 %v1059_v37  ;;  %v959_v49 = vpop.xlane.xlu0 %958 }
 0x352   :  { %2048 = vpow2.f32 %v1021_v43  ;;  %v989_v12 = vsub.f32 %v2682_v9, %v959_v49 }
 0x353   :  { %v2775_v45 = vpop.eup %2038  ;;  %v1019_v58 = vmul.f32 1.442695, %v982_v36 }
 0x354   :  { %v944_v20 = vpop.xlane.xlu1 %943  ;;  %v1065_v52 = vsel %vm320_vm2, %v2775_v45, 0.0  ;;  %v2780_v53 = vpop.eup %2040  ;;  %v1033_v9 = vmul.f32 1.442695, %v989_v12 }
 0x355   :  { %2050 = vpow2.f32 %v1019_v58  ;;  %v984_v47 = vsub.f32 %v2684_v33, %v944_v20  ;;  %1066 = vadd.xlane.f32.xlu0 %v1065_v52  ;;  %v965_v8 = vpop.xlane.xlu0 %964  ;;  %v1071_v42 = vsel %vm320_vm2, %v2780_v53, 0.0 }
 0x356   :  { %2052 = vpow2.f32 %v1025_v54  ;;  %v991_v0 = vsub.f32 %v2696_v32, %v965_v8 }
 0x357   :  { %v2783_v19 = vpop.eup %2042  ;;  %v1023_v17 = vmul.f32 1.442695, %v984_v47 }
 0x358   :  { %v950_v60 = vpop.xlane.xlu1 %949  ;;  %v1068_v43 = vsel %vm320_vm2, %v2783_v19, 0.0  ;;  %v2790_v29 = vpop.eup %2044  ;;  %v1037_v20 = vmul.f32 1.442695, %v991_v0 }
 0x359   :  { %2054 = vpow2.f32 %v1023_v17  ;;  %v986_v33 = vsub.f32 %v2698_v6, %v950_v60  ;;  %1072 = vadd.xlane.f32.xlu0 %v1071_v42  ;;  %1069 = vadd.xlane.f32.xlu1 %v1068_v43  ;;  %v1077_v49 = vsel %vm320_vm2, %v2790_v29, 0.0 }
 0x35a   :  { %2056 = vpow2.f32 %v1029_v38 }
 0x35b   :  { %v2793_v35 = vpop.eup %2046  ;;  %v1027_v37 = vmul.f32 1.442695, %v986_v33 }
 0x35c   :  { %v956_v36 = vpop.xlane.xlu1 %955  ;;  %v1074_v54 = vsel %vm320_vm2, %v2793_v35, 0.0  ;;  %v2800_v62 = vpop.eup %2048 }
 0x35d   :  { %2058 = vpow2.f32 %v1027_v37  ;;  %v988_v6 = vsub.f32 %v2707_v27, %v956_v36  ;;  %1078 = vadd.xlane.f32.xlu0 %v1077_v49  ;;  %1075 = vadd.xlane.f32.xlu1 %v1074_v54  ;;  %v1083_v47 = vsel %vm320_vm2, %v2800_v62, 0.0 }
 0x35e   :  { %2060 = vpow2.f32 %v1033_v9 }
 0x35f   :  { %v2803_v58 = vpop.eup %2050  ;;  %v1031_v32 = vmul.f32 1.442695, %v988_v6 }
 0x360   :  { %v962_v52 = vpop.xlane.xlu1 %961  ;;  %v1080_v38 = vsel %vm320_vm2, %v2803_v58, 0.0  ;;  %v2809_v12 = vpop.eup %2052 }
 0x361   :  { %2062 = vpow2.f32 %v1031_v32  ;;  %v990_v17 = vsub.f32 %v2714_v44, %v962_v52  ;;  %1084 = vadd.xlane.f32.xlu0 %v1083_v47  ;;  %1081 = vadd.xlane.f32.xlu1 %v1080_v38  ;;  %v1089_v42 = vsel %vm320_vm2, %v2809_v12, 0.0 }
 0x362   :  { %2064 = vpow2.f32 %v1037_v20 }
 0x363   :  { %v2812_v27 = vpop.eup %2054  ;;  %v1035_v8 = vmul.f32 1.442695, %v990_v17 }
 0x364   :  { %v968_v60 = vpop.xlane.xlu1 %967  ;;  %v1086_v43 = vsel %vm320_vm2, %v2812_v27, 0.0  ;;  %v2818_v33 = vpop.eup %2056 }
 0x365   :  { %2066 = vpow2.f32 %v1035_v8  ;;  %v992_v9 = vsub.f32 %v2721_v2, %v968_v60  ;;  %1090 = vadd.xlane.f32.xlu0 %v1089_v42  ;;  %1087 = vadd.xlane.f32.xlu1 %v1086_v43  ;;  %v1095_v37 = vsel %vm320_vm2, %v2818_v33, 0.0 }
 0x367   :  { %v2821_v44 = vpop.eup %2058  ;;  %v1039_v0 = vmul.f32 1.442695, %v992_v9 }
 0x368   :  { %v1092_v36 = vsel %vm320_vm2, %v2821_v44, 0.0  ;;  %v2827_v49 = vpop.eup %2060 }
 0x369   :  { %2068 = vpow2.f32 %v1039_v0  ;;  %1096 = vadd.xlane.f32.xlu0 %v1095_v37  ;;  %1093 = vadd.xlane.f32.xlu1 %v1092_v36  ;;  %v1101_v2 = vsel %vm320_vm2, %v2827_v49, 0.0 }
 0x36b   :  { %v2829_v54 = vpop.eup %2062 }
 0x36c   :  { %v1098_v6 = vsel %vm320_vm2, %v2829_v54, 0.0  ;;  %v2835_v20 = vpop.eup %2064 }
 0x36d   :  { %1102 = vadd.xlane.f32.xlu0 %v1101_v2  ;;  %1099 = vadd.xlane.f32.xlu1 %v1098_v6  ;;  %v1107_v52 = vsel %vm320_vm2, %v2835_v20, 0.0 }
 0x36f   :  { %v2837_v32 = vpop.eup %2066 }
 0x370   :  { %v1104_v47 = vsel %vm320_vm2, %v2837_v32, 0.0 }
 0x371   :  { %1108 = vadd.xlane.f32.xlu0 %v1107_v52  ;;  %1105 = vadd.xlane.f32.xlu1 %v1104_v47 }
 0x373   :  { %v2843_v38 = vpop.eup %2068 }
 0x374   :  { %v1110_v17 = vsel %vm320_vm2, %v2843_v38, 0.0 }
 0x375   :  { %1111 = vadd.xlane.f32.xlu1 %v1110_v17 }
 0x3c6   :  { %v1046_v8 = vpop.xlane.xlu1 %1045 }
 0x3c7   :  { %2070 = vrcp.f32 %v1046_v8  ;;  %v1043_v60 = vpop.xlane.xlu0 %1042 }
 0x3c8   :  { %2072 = vrcp.f32 %v1043_v60 }
 0x3ca   :  { %v1052_v42 = vpop.xlane.xlu1 %1051 }
 0x3cb   :  { %2074 = vrcp.f32 %v1052_v42 }
 0x3ce   :  { %v1049_v43 = vpop.xlane.xlu0 %1048 }
 0x3cf   :  { %2076 = vrcp.f32 %v1049_v43 }
 0x3d1   :  { %v2071_v9 = vpop.eup %2070 }
 0x3d2   :  { %v2073_v0 = vpop.eup %2072  ;;  %v1058_v37 = vpop.xlane.xlu1 %1057  ;;  %v1138_v2 = vmul.f32 %v2071_v9, %v2732_v24 }
 0x3d3   :  { %v1137_v36 = vmul.f32 %v2073_v0, %v2734_v4  ;;  %2078 = vrcp.f32 %v1058_v37 }
 0x3d5   :  { %1877 = vmatprep.mubr.msk.f32.mxu1 %vm320_vm2, %v1137_v36  ;;  %v2075_v52 = vpop.eup %2074 }
 0x3d6   :  { %v1055_v6 = vpop.xlane.xlu0 %1054  ;;  %1878 = vmatmul.mubr.msk.f32.vlgmr.msra.gmra.mrb[20].mxu1 %vm320_vm2, %v1138_v2  ;;  %v1140_v60 = vmul.f32 %v2075_v52, %v2741_v3 }
 0x3d7   :  { %2080 = vrcp.f32 %v1055_v6 }
 0x3d9   :  { %v2077_v47 = vpop.eup %2076 }
 0x3da   :  { %v1139_v17 = vmul.f32 %v2077_v47, %v2746_v48  ;;  %v1064_v8 = vpop.xlane.xlu1 %1063 }
 0x3db   :  { %2082 = vrcp.f32 %v1064_v8 }
 0x3dc   :  { %1880 = vmatprep.mubr.msk.f32.mxu1 %vm320_vm2, %v1139_v17 }
 0x3dd   :  { %1881 = vmatmul.mubr.msk.f32.gmra.mrb[22].mxu1 %vm320_vm2, %v1140_v60  ;;  %v2079_v4 = vpop.eup %2078 }
 0x3de   :  { %v1061_v24 = vpop.xlane.xlu0 %1060  ;;  %v1142_v0 = vmul.f32 %v2079_v4, %v2751_v10 }
 0x3df   :  { %2084 = vrcp.f32 %v1061_v24 }
 0x3e1   :  { %v2081_v42 = vpop.eup %2080 }
 0x3e2   :  { %v1067_v43 = vpop.xlane.xlu0 %1066  ;;  %v1141_v9 = vmul.f32 %v2081_v42, %v2757_v23 }
 0x3e3   :  { %2086 = vrcp.f32 %v1067_v43 }
 0x3e4   :  { %1883 = vmatprep.mubr.msk.f32.mxu1 %vm320_vm2, %v1141_v9 }
 0x3e5   :  { %1884 = vmatmul.mubr.msk.f32.gmra.mrb[24].mxu1 %vm320_vm2, %v1142_v0  ;;  %v2083_v37 = vpop.eup %2082 }
 0x3e6   :  { %v1073_v3 = vpop.xlane.xlu0 %1072  ;;  %v1070_v48 = vpop.xlane.xlu1 %1069  ;;  %v1144_v23 = vmul.f32 %v2083_v37, %v2763_v57 }
 0x3e7   :  { %2088 = vrcp.f32 %v1073_v3 }
 0x3e8   :  { %2090 = vrcp.f32 %v1070_v48 }
 0x3e9   :  { %v2085_v36 = vpop.eup %2084 }
 0x3ea   :  { %v1079_v2 = vpop.xlane.xlu0 %1078  ;;  %v1076_v6 = vpop.xlane.xlu1 %1075  ;;  %v1143_v52 = vmul.f32 %v2085_v36, %v2769_v15 }
 0x3eb   :  { %2092 = vrcp.f32 %v1079_v2 }
 0x3ec   :  { %2094 = vrcp.f32 %v1076_v6  ;;  %1886 = vmatprep.mubr.msk.f32.mxu1 %vm320_vm2, %v1143_v52 }
 0x3ed   :  { %v2087_v10 = vpop.eup %2086  ;;  %1887 = vmatmul.mubr.msk.f32.gmra.mrb[26].mxu1 %vm320_vm2, %v1144_v23 }
 0x3ee   :  { %v1085_v47 = vpop.xlane.xlu0 %1084  ;;  %v1082_v17 = vpop.xlane.xlu1 %1081  ;;  %v1145_v8 = vmul.f32 %v2087_v10, %v2775_v45 }
 0x3ef   :  { %2096 = vrcp.f32 %v1085_v47 }
 0x3f0   :  { %2098 = vrcp.f32 %v1082_v17  ;;  %1889 = vmatprep.mubr.msk.f32.mxu1 %vm320_vm2, %v1145_v8 }
 0x3f1   :  { %v2089_v60 = vpop.eup %2088 }
 0x3f2   :  { %v2091_v24 = vpop.eup %2090  ;;  %v1091_v15 = vpop.xlane.xlu0 %1090  ;;  %v1147_v57 = vmul.f32 %v2089_v60, %v2780_v53 }
 0x3f3   :  { %v1088_v4 = vpop.xlane.xlu1 %1087  ;;  %2100 = vrcp.f32 %v1091_v15  ;;  %v1146_v42 = vmul.f32 %v2091_v24, %v2783_v19 }
 0x3f4   :  { %2102 = vrcp.f32 %v1088_v4 }
 0x3f5   :  { %v2093_v43 = vpop.eup %2092  ;;  %1890 = vmatmul.mubr.msk.f32.gmra.mrb[28].mxu1 %vm320_vm2, %v1146_v42 }
 0x3f6   :  { %v2095_v9 = vpop.eup %2094  ;;  %1892 = vmatprep.mubr.msk.f32.mxu1 %vm320_vm2, %v1147_v57  ;;  %v1097_v45 = vpop.xlane.xlu0 %1096  ;;  %v1149_v3 = vmul.f32 %v2093_v43, %v2790_v29 }
 0x3f7   :  { %v1094_v0 = vpop.xlane.xlu1 %1093  ;;  %2104 = vrcp.f32 %v1097_v45  ;;  %v1148_v48 = vmul.f32 %v2095_v9, %v2793_v35 }
 0x3f8   :  { %2106 = vrcp.f32 %v1094_v0 }
 0x3f9   :  { %v2097_v37 = vpop.eup %2096  ;;  %1893 = vmatmul.mubr.msk.f32.gmra.mrb[30].mxu1 %vm320_vm2, %v1148_v48 }
 0x3fa   :  { %v2099_v53 = vpop.eup %2098  ;;  %1895 = vmatprep.mubr.msk.f32.mxu1 %vm320_vm2, %v1149_v3  ;;  %v1103_v19 = vpop.xlane.xlu0 %1102  ;;  %v1151_v2 = vmul.f32 %v2097_v37, %v2800_v62 }
 0x3fb   :  { %v1100_v36 = vpop.xlane.xlu1 %1099  ;;  %2108 = vrcp.f32 %v1103_v19  ;;  %v1150_v6 = vmul.f32 %v2099_v53, %v2803_v58 }
 0x3fc   :  { %2110 = vrcp.f32 %v1100_v36 }
 0x3fd   :  { %v2101_v52 = vpop.eup %2100  ;;  %1896 = vmatmul.mubr.msk.f32.gmra.mrb[32].mxu1 %vm320_vm2, %v1150_v6 }
 0x3fe   :  { %v2103_v29 = vpop.eup %2102  ;;  %1898 = vmatprep.mubr.msk.f32.mxu1 %vm320_vm2, %v1151_v2  ;;  %v1109_v35 = vpop.xlane.xlu0 %1108  ;;  %v1153_v10 = vmul.f32 %v2101_v52, %v2809_v12 }
 0x3ff   :  { %v1106_v23 = vpop.xlane.xlu1 %1105  ;;  %2112 = vrcp.f32 %v1109_v35  ;;  %v1152_v47 = vmul.f32 %v2103_v29, %v2812_v27 }
 0x400   :  { %2114 = vrcp.f32 %v1106_v23 }
 0x401   :  { %v2105_v17 = vpop.eup %2104  ;;  %1899 = vmatmul.mubr.msk.f32.gmra.mrb[34].mxu1 %vm320_vm2, %v1152_v47 }
 0x402   :  { %v2107_v62 = vpop.eup %2106  ;;  %1901 = vmatprep.mubr.msk.f32.mxu1 %vm320_vm2, %v1153_v10  ;;  %v1155_v8 = vmul.f32 %v2105_v17, %v2818_v33 }
 0x403   :  { %v1112_v58 = vpop.xlane.xlu1 %1111  ;;  %v1154_v60 = vmul.f32 %v2107_v62, %v2821_v44 }
 0x404   :  { %2116 = vrcp.f32 %v1112_v58 }
 0x405   :  { %v2109_v24 = vpop.eup %2108  ;;  %1902 = vmatmul.mubr.msk.f32.gmra.mrb[36].mxu1 %vm320_vm2, %v1154_v60 }
 0x406   :  { %v2111_v12 = vpop.eup %2110  ;;  %1904 = vmatprep.mubr.msk.f32.mxu1 %vm320_vm2, %v1155_v8  ;;  %v1157_v27 = vmul.f32 %v2109_v24, %v2827_v49  ;;  %v2121_v49 = vmov 0.0|0.0  }
 0x407   :  { %v1156_v15 = vmul.f32 %v2111_v12, %v2829_v54  ;;  %1958 = vmatprep.subr.bf16.mxu0 %v2121_v49  ;;  %v2897_v54 = vadd.s32 128, %v2187_v18 }
 0x409   :  { %v2113_v4 = vpop.eup %2112  ;;  %1905 = vmatmul.mubr.msk.f32.gmra.mrb[38].mxu1 %vm320_vm2, %v1156_v15  ;;  %v311_v9 = vand.u32 15, %v2897_v54  ;;  %v34_v54 = vld [vmem:[%s2987_s2 + $0x28] sm:$0xff] }
 0x40a   :  { %v2115_v57 = vpop.eup %2114  ;;  %1907 = vmatprep.mubr.msk.f32.mxu1 %vm320_vm2, %v1157_v27  ;;  %v1159_v33 = vmul.f32 %v2113_v4, %v2835_v20  ;;  %v2997_v20 = vmov 0.0  }
 0x40b   :  { %v1158_v44 = vmul.f32 %v2115_v57, %v2837_v32  ;;  %vm313_vm1 = vcmp.eq.s32.totalorder %v311_v9, %v2182_v16 }
 0x40c   :  { %v317_v32 = vsel %vm313_vm1, 1.0, %v2997_v20 }
 0x40d   :  { %1908 = vmatmul.mubr.msk.f32.gmra.mrb[40].mxu1 %vm320_vm2, %v1158_v44  ;;  %1698 = vmatprep.mubr.msk.f32.mxu0 %vm635_vm15, %v317_v32 }
 0x40e   :  { %v2117_v42 = vpop.eup %2116  ;;  %1910 = vmatprep.mubr.msk.f32.mxu1 %vm320_vm2, %v1159_v33 }
 0x40f   :  { %v1160_v43 = vmul.f32 %v2117_v42, %v2843_v38 }
 0x411   :  { %1911 = vmatmul.mubr.msk.f32.gmra.mrb[42].mxu1 %vm320_vm2, %v1160_v43  ;;  %vm315_vm2 = vcmp.eq.s32.totalorder %v311_v9, %v2203_v28  ;;  %v2122_v9 = vmov 1.0  }
 0x4a9   :  { %v1879_v45 = vpop.f32.mrb[20].mxu1 }
 0x4aa   :  { %v1422_v38 = vmul.f32 %v1879_v45, %v2404_v14  ;;  %v1302_v0 = vpop.f32.mrb[21].mxu1 }
 0x4ab   :  { %v1421_v3 = vmul.f32 %v1302_v0, %v2399_v11 }
 0x4ad   :  { %v1959_v48 = vpack.c.bf16 %v1422_v38, %v1421_v3 }
 0x4af   :  { %1960 = vmatpush1.bf16.msra.mxu0 %v1959_v48 }
 0x4b0   :  { %v1882_v37 = vpop.f32.mrb[22].mxu1  ;;  %1961 = vmatprep.subr.bf16.mxu0 %v2121_v49 }
 0x4b1   :  { %v1424_v53 = vmul.f32 %v1882_v37, %v2420_v34  ;;  %v1312_v19 = vpop.f32.mrb[23].mxu1 }
 0x4b2   :  { %v1423_v36 = vmul.f32 %v1312_v19, %v2411_v21 }
 0x4b4   :  { %v1962_v2 = vpack.c.bf16 %v1424_v53, %v1423_v36 }
 0x4b6   :  { %1963 = vmatpush1.bf16.msra.mxu0 %v1962_v2  ;;  %v31_v2 = vld [vmem:[%s2987_s2 + $0x10] sm:$0xff] }
 0x4b7   :  { %1964 = vmatprep.subr.bf16.mxu0 %v2121_v49 }
 0x4b8   :  { %v1885_v6 = vpop.f32.mrb[24].mxu1 }
 0x4b9   :  { %v1426_v14 = vmul.f32 %v1885_v6, %v2428_v40  ;;  %v1322_v52 = vpop.f32.mrb[25].mxu1  ;;  %v36_v6 = vld [vmem:[%s2987_s2 + $0x38] sm:$0xff] }
 0x4ba   :  { %v1425_v11 = vmul.f32 %v1322_v52, %v2416_v25 }
 0x4bc   :  { %v1965_v29 = vpack.c.bf16 %v1426_v14, %v1425_v11 }
 0x4be   :  { %1966 = vmatpush1.bf16.msra.mxu0 %v1965_v29 }
 0x4bf   :  { %1967 = vmatprep.subr.bf16.mxu0 %v2121_v49 }
 0x4c0   :  { %v1888_v35 = vpop.f32.mrb[26].mxu1 }
 0x4c1   :  { %v1428_v34 = vmul.f32 %v1888_v35, %v2443_v51  ;;  %v1332_v23 = vpop.f32.mrb[27].mxu1  ;;  %v1702_v35 = vld [vmem:[%s2987_s2 + $0x40] ss:$0 sm:$0xff] }
 0x4c2   :  { %v1427_v21 = vmul.f32 %v1332_v23, %v2434_v46 }
 0x4c4   :  { %v1968_v10 = vpack.c.bf16 %v1428_v34, %v1427_v21 }
 0x4c6   :  { %1969 = vmatpush1.bf16.msra.mxu0 %v1968_v10 }
 0x4c7   :  { %1970 = vmatprep.subr.bf16.mxu0 %v2121_v49 }
 0x4c8   :  { %v1891_v47 = vpop.f32.mrb[28].mxu1 }
 0x4c9   :  { %v1430_v40 = vmul.f32 %v1891_v47, %v2457_v59  ;;  %v1342_v17 = vpop.f32.mrb[29].mxu1 }
 0x4ca   :  { %v1429_v25 = vmul.f32 %v1342_v17, %v2449_v55 }
 0x4cc   :  { %v1971_v62 = vpack.c.bf16 %v1430_v40, %v1429_v25  ;;  %v1894_v58 = vpop.f32.mrb[30].mxu1 }
 0x4cd   :  { %v1432_v8 = vmul.f32 %v1894_v58, %v2471_v5  ;;  %v1352_v60 = vpop.f32.mrb[31].mxu1 }
 0x4ce   :  { %v1431_v51 = vmul.f32 %v1352_v60, %v2463_v63  ;;  %1972 = vmatpush1.bf16.msra.mxu0 %v1971_v62 }
 0x4cf   :  { %1973 = vmatprep.subr.bf16.mxu0 %v2121_v49 }
 0x4d0   :  { %v1974_v46 = vpack.c.bf16 %v1432_v8, %v1431_v51  ;;  %v1897_v24 = vpop.f32.mrb[32].mxu1 }
 0x4d1   :  { %v1434_v12 = vmul.f32 %v1897_v24, %v2485_v31  ;;  %v1362_v27 = vpop.f32.mrb[33].mxu1 }
 0x4d2   :  { %v1433_v59 = vmul.f32 %v1362_v27, %v2477_v7  ;;  %1975 = vmatpush1.bf16.msra.mxu0 %v1974_v46 }
 0x4d3   :  { %1976 = vmatprep.subr.bf16.mxu0 %v2121_v49 }
 0x4d4   :  { %v1977_v55 = vpack.c.bf16 %v1434_v12, %v1433_v59  ;;  %v1900_v15 = vpop.f32.mrb[34].mxu1 }
 0x4d5   :  { %v1436_v5 = vmul.f32 %v1900_v15, %v2499_v26  ;;  %v1372_v4 = vpop.f32.mrb[35].mxu1 }
 0x4d6   :  { %v1435_v63 = vmul.f32 %v1372_v4, %v2491_v13  ;;  %1978 = vmatpush1.bf16.msra.mxu0 %v1977_v55 }
 0x4d7   :  { %1979 = vmatprep.subr.bf16.mxu0 %v2121_v49 }
 0x4d8   :  { %v1980_v57 = vpack.c.bf16 %v1436_v5, %v1435_v63  ;;  %v1903_v33 = vpop.f32.mrb[36].mxu1 }
 0x4d9   :  { %v1438_v31 = vmul.f32 %v1903_v33, %v2513_v41  ;;  %v1382_v44 = vpop.f32.mrb[37].mxu1 }
 0x4da   :  { %v1437_v7 = vmul.f32 %v1382_v44, %v2505_v22  ;;  %1981 = vmatpush1.bf16.msra.mxu0 %v1980_v57 }
 0x4db   :  { %1982 = vmatprep.subr.bf16.mxu0 %v2121_v49 }
 0x4dc   :  { %v1983_v42 = vpack.c.bf16 %v1438_v31, %v1437_v7  ;;  %v1906_v43 = vpop.f32.mrb[38].mxu1 }
 0x4dd   :  { %v1440_v26 = vmul.f32 %v1906_v43, %v2527_v50  ;;  %v1392_v32 = vpop.f32.mrb[39].mxu1  ;;  %v29_v50 = vld [vmem:[%s2987_s2] sm:$0xff] }
 0x4de   :  { %v1439_v13 = vmul.f32 %v1392_v32, %v2519_v30  ;;  %1984 = vmatpush1.bf16.msra.mxu0 %v1983_v42  ;;  %v30_v30 = vld [vmem:[%s2987_s2 + $0x8] sm:$0xff] }
 0x4df   :  { %1985 = vmatprep.subr.bf16.mxu0 %v2121_v49  ;;  %v1994_v19 = vpack.c.bf16 %v30_v30, %v29_v50 }
 0x4e0   :  { %v1986_v45 = vpack.c.bf16 %v1440_v26, %v1439_v13  ;;  %v1909_v38 = vpop.f32.mrb[40].mxu1 }
 0x4e1   :  { %v1442_v41 = vmul.f32 %v1909_v38, %v2540_v56  ;;  %v1402_v0 = vpop.f32.mrb[41].mxu1 }
 0x4e2   :  { %v1441_v22 = vmul.f32 %v1402_v0, %v2533_v39  ;;  %1987 = vmatpush1.bf16.msra.mxu0 %v1986_v45  ;;  %v310_v39 = vand.u32 15, %v2187_v18  ;;  %v319_v18 = vsel %vm315_vm2, 1.0, %v2997_v20  ;;  %v35_v20 = vld [vmem:[%s2987_s2 + $0x30] sm:$0xff] }
 0x4e3   :  { %1988 = vmatprep.subr.bf16.mxu0 %v2121_v49  ;;  %v2006_v14 = vpack.c.bf16 %v36_v6, %v35_v20 }
 0x4e4   :  { %v1989_v3 = vpack.c.bf16 %v1442_v41, %v1441_v22  ;;  %v1912_v48 = vpop.f32.mrb[42].mxu1  ;;  %vm312_vm3 = vcmp.eq.s32.totalorder %v310_v39, %v2182_v16  ;;  %vm314_vm4 = vcmp.eq.s32.totalorder %v310_v39, %v2203_v28 }
 0x4e5   :  { %v1444_v37 = vmul.f32 %v1912_v48, %v2551_v1  ;;  %v1412_v53 = vpop.f32.mrb[43].mxu1  ;;  %v32_v1 = vld [vmem:[%s2987_s2 + $0x18] sm:$0xff] }
 0x4e6   :  { %v1443_v56 = vmul.f32 %v1412_v53, %v2546_v61  ;;  %1990 = vmatpush1.bf16.msra.mxu0 %v1989_v3  ;;  %v1998_v61 = vpack.c.bf16 %v32_v1, %v31_v2 }
 0x4e7   :  { %1991 = vmatprep.subr.bf16.mxu0 %v2121_v49  ;;  %v33_v49 = vld [vmem:[%s2987_s2 + $0x20] sm:$0xff] }
 0x4e8   :  { %v1992_v36 = vpack.c.bf16 %v1444_v37, %v1443_v56  ;;  %v2002_v16 = vpack.c.bf16 %v34_v54, %v33_v49 }
 0x4ea   :  { %1993 = vmatpush1.bf16.msra.mxu0 %v1992_v36 }
 0x4eb   :  { %1995 = vmatprep.subr.bf16.mxu0 %v1994_v19 }
 0x4ed   :  { %1699 = vmatmul.mubr.msk.f32.vlgmr.msra.gmra.mrb[32].mxu0 %vm312_vm3, %v2122_v9 }
 0x4ee   :  { %1700 = vmatprep.mubr.msk.f32.mxu0 %vm635_vm15, %v319_v18  ;;  %1997 = vmatpush3.bf16.msra.mxu0 %v1994_v19 }
 0x4ef   :  { %1999 = vmatprep.subr.bf16.mxu0 %v1998_v61 }
 0x4f1   :  { %1701 = vmatmul.mubr.msk.f32.gmra.mrb[34].mxu0 %vm314_vm4, %v2122_v9 }
 0x4f2   :  { %2001 = vmatpush3.bf16.msra.mxu0 %v1998_v61 }
 0x4f3   :  { %2003 = vmatprep.subr.bf16.mxu0 %v2002_v16 }
 0x4f6   :  { %2005 = vmatpush3.bf16.msra.mxu0 %v2002_v16 }
 0x4f7   :  { %2007 = vmatprep.subr.bf16.mxu0 %v2006_v14 }
 0x4fa   :  { %2009 = vmatpush3.bf16.msra.mxu0 %v2006_v14 }
 0x5c0   :  { %v1517_v52 = vpop.f32.mrb[32].mxu0 }
 0x5c1   :  { %v1519_v28 = vpop.f32.mrb[33].mxu0  ;;  %1929 = vmatprep.mubr.msk.f32.mxu0 %vm635_vm15, %v1517_v52 }
 0x5c4   :  { %v1522_v11 = vpop.f32.mrb[34].mxu0 }
 0x5c5   :  { %v1524_v29 = vpop.f32.mrb[35].mxu0  ;;  %1930 = vmatmul.mubr.msk.f32.vlgmr.msra.gmra.mrb[36].mxu0 %vm635_vm15, %v1522_v11 }
 0x698   :  { %v1931_v34 = vpop.f32.mrb[36].mxu0 }
 0x699   :  { %v1608_v23 = vadd.f32 %v1931_v34, %v1702_v35  ;;  %v1602_v21 = vpop.f32.mrb[37].mxu0 }
 0x69a   :  { %v1603_v10 = vadd.f32 %v1702_v35, %v1602_v21 }
 0x69b   :  { %1613 = vst.msk [vmem:[%s2988_s4 + $0x8] sm:$0xf] %vm1612_vm5, %v1608_v23 }
 0x69c   :  { %1611 = vst.msk [vmem:[%s2988_s4] sm:$0xff] %vm49_vm0, %v1603_v10 }

</bundles_post_ra>
